<compile_context>
chip_gen: v6e
topology: v6e:2x2x1
jax: 0.10.0
libtpu: 0.0.40
codegen_flags: <defaults>
</compile_context>

<pallas_src>
import functools

import jax
import jax.numpy as jnp
import numpy as np
from jax.experimental import pallas as pl
from jax.experimental.pallas import tpu as pltpu


# Flip to jnp.bfloat16 on v6e/v7x for full-rate MXU + half the patch/weight DMA
# bytes (accumulation stays f32 via preferred_element_type).
MXU_DTYPE = jnp.float32

_TK = 256          # K tile (multiple of 128 -> MXU/lane aligned on v5e/v6e/v7x)
_TM_MAX = 256      # M tile cap; at real resolutions size this against VMEM


# ----------------------------------------------------------------------------
# Pallas kernels
# ----------------------------------------------------------------------------
def _conv_matmul_kernel(a_ref, w_ref, b_ref, o_ref, acc_ref):
    """One (tm x tk) x (tk x Cout) MXU step of the im2col conv matmul."""
    k = pl.program_id(1)

    @pl.when(k == 0)
    def _init():
        acc_ref[...] = jnp.zeros_like(acc_ref)

    acc_ref[...] += jnp.dot(a_ref[...], w_ref[...],
                            preferred_element_type=jnp.float32)

    @pl.when(k == pl.num_programs(1) - 1)
    def _finalize():
        o_ref[...] = (acc_ref[...] + b_ref[...]).astype(o_ref.dtype)


def _pool_kernel(x_ref, o_ref, *, k, wg, cg):
    """MaxPool3d(k) over one batch element and one output-H row group.

    Input block is (1, k, W, C) in NHWC with C on lanes.  The conv output
    channels were pre-permuted (at weight-pack time) so pool group g occupies
    lanes {i*cg + g : i in [0, k)}; the channel-group reduction is therefore a
    chain of jnp.maximum over *contiguous* lane slices (no lane reshapes or
    strided lane access), and the spatial reduction is a sublane max.
    """
    x = x_ref[0]                               # (k, W, C)
    x = x[:, : wg * k, :]                      # floor (MaxPool3d drops remainder)
    x = x.reshape(k, wg, k, x.shape[-1])       # split W into wg windows of k cols
    s = jnp.max(jnp.max(x, axis=2), axis=0)    # (wg, C): spatial max
    m = s[:, 0:cg]
    for i in range(1, k):                      # channel-group max, lane-contiguous
        m = jnp.maximum(m, s[:, i * cg:(i + 1) * cg])
    o_ref[...] = m.reshape(1, 1, wg, cg)


# ----------------------------------------------------------------------------
# Conv wrapper
# ----------------------------------------------------------------------------
def _im2col_3x3(x_nhwc, stride):
    # TODO(synk): build the 9 taps inside the kernel from a halo'd NHWC tile
    # (manual make_async_copy) so the im2col matrix is never materialized in
    # HBM; at 16x16 the expansion (9x only for the 3-channel layer1, 2.25x for
    # the stride-2 layers) is negligible, so it stays host-side here.
    n, h, w, c = x_nhwc.shape
    xp = jnp.pad(x_nhwc, ((0, 0), (1, 1), (1, 1), (0, 0)))
    ho = (h + 2 - 3) // stride + 1
    wo = (w + 2 - 3) // stride + 1
    cols = []
    for ky in range(3):
        for kx in range(3):
            cols.append(
                xp[:, ky:ky + stride * (ho - 1) + 1:stride,
                   kx:kx + stride * (wo - 1) + 1:stride, :])
    patches = jnp.stack(cols, axis=-2)            # (N, Ho, Wo, 9, C)
    return patches.reshape(n * ho * wo, 9 * c), n, ho, wo


def conv3x3(x_nhwc, w_oihw, b, stride, perm_in=None, perm_out=None):
    """3x3 conv, padding=1, given stride.  NHWC in / NHWC out.

    perm_in : channel permutation already applied to x_nhwc by the previous
              layer (folded into this layer's weight input-channel axis).
    perm_out: permutation applied to this layer's output channels (folded into
              the weight columns + bias) so the downstream MaxPool3d kernel is
              lane-dense.  Zero runtime cost.
    """
    cout, cin = w_oihw.shape[0], w_oihw.shape[1]
    if perm_in is not None:
        w_oihw = w_oihw[:, perm_in, :, :]
    w_flat = jnp.transpose(w_oihw, (2, 3, 1, 0)).reshape(9 * cin, cout)
    if perm_out is not None:
        w_flat = w_flat[:, perm_out]
        b = b[perm_out]

    a, n, ho, wo = _im2col_3x3(x_nhwc, stride)    # (M, 9*Cin), tap-major / cin-minor
    m, kdim = a.shape

    # K tiling: single tile if small, otherwise zero-pad K to a multiple of 256
    # so every `a` block's last dim is 128/256-aligned.
    if kdim <= _TK:
        tk, kpad = kdim, kdim
    else:
        tk = _TK
        kpad = ((kdim + _TK - 1) // _TK) * _TK
        a = jnp.pad(a, ((0, 0), (0, kpad - kdim)))
        w_flat = jnp.pad(w_flat, ((0, kpad - kdim), (0, 0)))

    a = a.astype(MXU_DTYPE)
    w_flat = w_flat.astype(MXU_DTYPE)
    b2d = b.reshape(1, cout).astype(jnp.float32)

    tm = _TM_MAX if m % _TM_MAX == 0 else m
    grid = (m // tm, kpad // tk)

    out = pl.pallas_call(
        _conv_matmul_kernel,
        out_shape=jax.ShapeDtypeStruct((m, cout), jnp.float32),
        grid_spec=pltpu.PrefetchScalarGridSpec(
            num_scalar_prefetch=0,
            grid=grid,
            in_specs=[
                pl.BlockSpec((tm, tk), lambda i, k: (i, k)),
                pl.BlockSpec((tk, cout), lambda i, k: (k, 0)),
                pl.BlockSpec((1, cout), lambda i, k: (0, 0)),
            ],
            out_specs=pl.BlockSpec((tm, cout), lambda i, k: (i, 0)),
            scratch_shapes=[pltpu.VMEM((tm, cout), jnp.float32)],
        ),
        compiler_params=pltpu.CompilerParams(
            dimension_semantics=("parallel", "arbitrary"),
            vmem_limit_bytes=32 * 1024 * 1024),
        cost_estimate=pl.CostEstimate(
            flops=int(2 * m * kpad * cout),
            transcendentals=0,
            bytes_accessed=int((m * kpad + kpad * cout) * a.dtype.itemsize
                               + m * cout * 4)),
    )(a, w_flat, b2d)
    return out.reshape(n, ho, wo, cout)


# ----------------------------------------------------------------------------
# MaxPool3d wrapper
# ----------------------------------------------------------------------------
def _pool_perm(c, k):
    """Output-channel permutation that makes MaxPool3d(k) lane-dense.

    Permuted position p holds original channel (p % (c//k))*k + p//(c//k), i.e.
    member i of pool group g lands on lane i*(c//k) + g.
    """
    cg = c // k
    p = np.arange(c)
    return (p % cg) * k + (p // cg)


def maxpool3d_grouped(y_nhwc, k):
    """nn.MaxPool3d(k) on a 4-D activation stored as channel-permuted NHWC.

    Returns (N, H//k, W//k, C//k) with the pooled channel groups on lanes.
    """
    n, h, w, c = y_nhwc.shape
    hg, wg, cg = h // k, w // k, c // k
    return pl.pallas_call(
        functools.partial(_pool_kernel, k=k, wg=wg, cg=cg),
        out_shape=jax.ShapeDtypeStruct((n, hg, wg, cg), y_nhwc.dtype),
        grid_spec=pltpu.PrefetchScalarGridSpec(
            num_scalar_prefetch=0,
            grid=(n, hg),
            in_specs=[pl.BlockSpec((1, k, w, c), lambda ni, hi: (ni, hi, 0, 0))],
            out_specs=pl.BlockSpec((1, 1, wg, cg), lambda ni, hi: (ni, hi, 0, 0)),
        ),
        compiler_params=pltpu.CompilerParams(
            dimension_semantics=("parallel", "parallel")),
        cost_estimate=pl.CostEstimate(
            flops=int(n * h * w * c),
            transcendentals=0,
            bytes_accessed=int(n * h * w * c * 4 + n * hg * wg * cg * 4)),
    )(y_nhwc)


# ----------------------------------------------------------------------------
# Full forward pass
# ----------------------------------------------------------------------------
def feature_extractor(x_nchw, params):
    # One NCHW->NHWC transpose of the *network input*; all activations stay
    # channel-on-lanes NHWC afterwards (no activation transposes / 7-D shuffles).
    x = jnp.transpose(x_nchw, (0, 2, 3, 1))

    perm2 = _pool_perm(64, 8)     # out2 pooled with k=8
    perm3 = _pool_perm(128, 4)    # out3 pooled with k=4
    perm4 = _pool_perm(256, 2)    # out4 pooled with k=2

    out1 = conv3x3(x, params["w1"], params["b1"], stride=1)
    out2p = conv3x3(out1, params["w2"], params["b2"], stride=2,
                    perm_out=perm2)
    out3p = conv3x3(out2p, params["w3"], params["b3"], stride=2,
                    perm_in=perm2, perm_out=perm3)
    out4p = conv3x3(out3p, params["w4"], params["b4"], stride=2,
                    perm_in=perm3, perm_out=perm4)

    p2 = maxpool3d_grouped(out2p, 8)   # (N, 1, 1,   8)
    p3 = maxpool3d_grouped(out3p, 4)   # (N, 1, 1,  32)
    p4 = maxpool3d_grouped(out4p, 2)   # (N, 1, 1, 128)

    def to_nchw(t):                    # pooled tensors are tiny; this is noise
        return jnp.transpose(t, (0, 3, 1, 2))

    return jnp.concatenate([to_nchw(p2), to_nchw(p3), to_nchw(p4)], axis=1)


# ----------------------------------------------------------------------------
# Pure-JAX reference (unpermuted weights, plain ops) for correctness check
# ----------------------------------------------------------------------------
def _ref_forward(x, params):
    def conv(x, w, b, s):
        y = jax.lax.conv_general_dilated(
            x, w, window_strides=(s, s), padding=((1, 1), (1, 1)),
            dimension_numbers=("NCHW", "OIHW", "NCHW"))
        return y + b[None, :, None, None]

    o1 = conv(x, params["w1"], params["b1"], 1)
    o2 = conv(o1, params["w2"], params["b2"], 2)
    o3 = conv(o2, params["w3"], params["b3"], 2)
    o4 = conv(o3, params["w4"], params["b4"], 2)

    def mp(t, k):
        n, c, h, w = t.shape
        tr = t.reshape(n, c // k, k, h // k, k, w // k, k)
        return jnp.max(tr, axis=(2, 4, 6))

    return jnp.concatenate([mp(o2, 8), mp(o3, 4), mp(o4, 2)], axis=1)


# ----------------------------------------------------------------------------
def _init_params(key):
    ks = jax.random.split(key, 8)

    def conv_p(kw, kb, cout, cin):
        w = 0.05 * jax.random.normal(kw, (cout, cin, 3, 3), jnp.float32)
        b = 0.05 * jax.random.normal(kb, (cout,), jnp.float32)
        return w, b

    w1, b1 = conv_p(ks[0], ks[1], 64, 3)
    w2, b2 = conv_p(ks[2], ks[3], 64, 64)
    w3, b3 = conv_p(ks[4], ks[5], 128, 64)
    w4, b4 = conv_p(ks[6], ks[7], 256, 128)
    return dict(w1=w1, b1=b1, w2=w2, b2=b2, w3=w3, b3=b3, w4=w4, b4=b4)


if __name__ == "__main__":
    key = jax.random.PRNGKey(0)
    k_x, k_p = jax.random.split(key)
    params = _init_params(k_p)

    # Small input consistent with the module: N=2, C=3 (RGB), 16x16 spatial.
    x = jax.random.normal(k_x, (2, 3, 16, 16), jnp.float32)

    out = jax.jit(functools.partial(feature_extractor, params=params))(x)
    out = jax.block_until_ready(out)

    ref = jax.block_until_ready(_ref_forward(x, params))
    assert out.shape == (2, 8 + 32 + 128, 1, 1), out.shape
    tol = 1e-3 if MXU_DTYPE == jnp.float32 else 5e-2
    assert jnp.allclose(out, ref, atol=tol, rtol=tol), (
        "mismatch vs reference: max abs err = "
        f"{float(jnp.max(jnp.abs(out - ref)))}")

    print("KERNEL_OK")
</pallas_src>

<mosaic_0001>
module attributes {stable_mosaic.version = 11 : i64} {
  func.func @_conv_matmul_kernel(%arg0: i32, %arg1: i32, %arg2: memref<256x27xf32, #tpu.memory_space<vmem>>, %arg3: memref<27x64xf32, #tpu.memory_space<vmem>>, %arg4: memref<1x64xf32, #tpu.memory_space<vmem>>, %arg5: memref<256x64xf32, #tpu.memory_space<vmem>>, %arg6: memref<256x64xf32, #tpu.memory_space<vmem>>) attributes {dimension_semantics = [#tpu.dimension_semantics<parallel>, #tpu.dimension_semantics<arbitrary>], iteration_bounds = array<i64: 2, 1>, scalar_prefetch = 0 : i64, scratch_operands = 1 : i64, tpu.core_type = #tpu.core_type<tc>, window_params = [{transform_indices = @transform_0, window_bounds = array<i64: 256, 27>}, {transform_indices = @transform_1, window_bounds = array<i64: 27, 64>}, {pipeline_mode = #tpu.pipeline_mode<synchronous>, transform_indices = @transform_2, window_bounds = array<i64: 1, 64>}, {transform_indices = @transform_3, window_bounds = array<i64: 256, 64>}]} {
    %c0_i32 = arith.constant 0 : i32
    %0 = arith.cmpi eq, %arg1, %c0_i32 : i32
    %1 = arith.extui %0 : i1 to i32
    %c0_i32_0 = arith.constant 0 : i32
    %2 = arith.cmpi ne, %1, %c0_i32_0 : i32
    scf.if %2 {
      %cst_10 = arith.constant 0.000000e+00 : f32
      %12 = vector.broadcast %cst_10 : f32 to vector<256x64xf32>
      %c0_11 = arith.constant 0 : index
      %c0_12 = arith.constant 0 : index
      %13 = vector.load %arg6[%c0_11, %c0_12] : memref<256x64xf32, #tpu.memory_space<vmem>>, vector<256x64xf32>
      tpu.vector_store %arg6[%c0_11, %c0_12], %12 {strides = array<i32>} : memref<256x64xf32, #tpu.memory_space<vmem>>, vector<256x64xf32>,
    } else {
    }
    %c0 = arith.constant 0 : index
    %c0_1 = arith.constant 0 : index
    %3 = vector.load %arg6[%c0, %c0_1] : memref<256x64xf32, #tpu.memory_space<vmem>>, vector<256x64xf32>
    %c0_2 = arith.constant 0 : index
    %c0_3 = arith.constant 0 : index
    %4 = vector.load %arg2[%c0_2, %c0_3] : memref<256x27xf32, #tpu.memory_space<vmem>>, vector<256x27xf32>
    %c0_4 = arith.constant 0 : index
    %c0_5 = arith.constant 0 : index
    %5 = vector.load %arg3[%c0_4, %c0_5] : memref<27x64xf32, #tpu.memory_space<vmem>>, vector<27x64xf32>
    %cst = arith.constant dense<0.000000e+00> : vector<256x64xf32>
    %6 = tpu.matmul %4, %5, %cst {dimension_numbers = #tpu.dot_dimension_numbers<[1], [0], [0], [1], [0, 0, 1, 1], [], []>} : vector<256x27xf32>, vector<27x64xf32>, vector<256x64xf32> -> vector<256x64xf32>
    %7 = arith.addf %3, %6 : vector<256x64xf32>
    %c0_6 = arith.constant 0 : index
    %c0_7 = arith.constant 0 : index
    %8 = vector.load %arg6[%c0_6, %c0_7] : memref<256x64xf32, #tpu.memory_space<vmem>>, vector<256x64xf32>
    tpu.vector_store %arg6[%c0_6, %c0_7], %7 {strides = array<i32>} : memref<256x64xf32, #tpu.memory_space<vmem>>, vector<256x64xf32>,
    %c0_i32_8 = arith.constant 0 : i32
    %9 = arith.cmpi eq, %arg1, %c0_i32_8 : i32
    %10 = arith.extui %9 : i1 to i32
    %c0_i32_9 = arith.constant 0 : i32
    %11 = arith.cmpi ne, %10, %c0_i32_9 : i32
    scf.if %11 {
      %c0_10 = arith.constant 0 : index
      %c0_11 = arith.constant 0 : index
      %12 = vector.load %arg6[%c0_10, %c0_11] : memref<256x64xf32, #tpu.memory_space<vmem>>, vector<256x64xf32>
      %c0_12 = arith.constant 0 : index
      %c0_13 = arith.constant 0 : index
      %13 = vector.load %arg4[%c0_12, %c0_13] : memref<1x64xf32, #tpu.memory_space<vmem>>, vector<1x64xf32>
      %14 = vector.broadcast %13 : vector<1x64xf32> to vector<256x64xf32>
      %15 = arith.addf %12, %14 : vector<256x64xf32>
      %c0_14 = arith.constant 0 : index
      %c0_15 = arith.constant 0 : index
      %16 = vector.load %arg5[%c0_14, %c0_15] : memref<256x64xf32, #tpu.memory_space<vmem>>, vector<256x64xf32>
      tpu.vector_store %arg5[%c0_14, %c0_15], %15 {strides = array<i32>} : memref<256x64xf32, #tpu.memory_space<vmem>>, vector<256x64xf32>,
    } else {
    }
    return
  }
  func.func @transform_0(%arg0: i32, %arg1: i32) -> (i32, i32) {
    %c0_i32 = arith.constant 0 : i32
    return %arg0, %arg1 : i32, i32
  }
  func.func @transform_1(%arg0: i32, %arg1: i32) -> (i32, i32) {
    %c0_i32 = arith.constant 0 : i32
    %c0_i32_0 = arith.constant 0 : i32
    return %arg1, %c0_i32 : i32, i32
  }
  func.func @transform_2(%arg0: i32, %arg1: i32) -> (i32, i32) {
    %c0_i32 = arith.constant 0 : i32
    %c0_i32_0 = arith.constant 0 : i32
    %c0_i32_1 = arith.constant 0 : i32
    return %c0_i32, %c0_i32_0 : i32, i32
  }
  func.func @transform_3(%arg0: i32, %arg1: i32) -> (i32, i32) {
    %c0_i32 = arith.constant 0 : i32
    %c0_i32_0 = arith.constant 0 : i32
    return %arg0, %c0_i32 : i32, i32
  }
}

module attributes {stable_mosaic.version = 11 : i64} {
  func.func @_conv_matmul_kernel(%arg0: i32, %arg1: i32, %arg2: memref<128x256xf32, #tpu.memory_space<vmem>>, %arg3: memref<256x64xf32, #tpu.memory_space<vmem>>, %arg4: memref<1x64xf32, #tpu.memory_space<vmem>>, %arg5: memref<128x64xf32, #tpu.memory_space<vmem>>, %arg6: memref<128x64xf32, #tpu.memory_space<vmem>>) attributes {dimension_semantics = [#tpu.dimension_semantics<parallel>, #tpu.dimension_semantics<arbitrary>], iteration_bounds = array<i64: 1, 3>, scalar_prefetch = 0 : i64, scratch_operands = 1 : i64, tpu.core_type = #tpu.core_type<tc>, window_params = [{transform_indices = @transform_0, window_bounds = array<i64: 128, 256>}, {transform_indices = @transform_1, window_bounds = array<i64: 256, 64>}, {pipeline_mode = #tpu.pipeline_mode<synchronous>, transform_indices = @transform_2, window_bounds = array<i64: 1, 64>}, {transform_indices = @transform_3, window_bounds = array<i64: 128, 64>}]} {
    %c0_i32 = arith.constant 0 : i32
    %0 = arith.cmpi eq, %arg1, %c0_i32 : i32
    %1 = arith.extui %0 : i1 to i32
    %c0_i32_0 = arith.constant 0 : i32
    %2 = arith.cmpi ne, %1, %c0_i32_0 : i32
    scf.if %2 {
      %cst_9 = arith.constant 0.000000e+00 : f32
      %12 = vector.broadcast %cst_9 : f32 to vector<128x64xf32>
      %c0_10 = arith.constant 0 : index
      %c0_11 = arith.constant 0 : index
      %13 = vector.load %arg6[%c0_10, %c0_11] : memref<128x64xf32, #tpu.memory_space<vmem>>, vector<128x64xf32>
      tpu.vector_store %arg6[%c0_10, %c0_11], %12 {strides = array<i32>} : memref<128x64xf32, #tpu.memory_space<vmem>>, vector<128x64xf32>,
    } else {
    }
    %c0 = arith.constant 0 : index
    %c0_1 = arith.constant 0 : index
    %3 = vector.load %arg6[%c0, %c0_1] : memref<128x64xf32, #tpu.memory_space<vmem>>, vector<128x64xf32>
    %c0_2 = arith.constant 0 : index
    %c0_3 = arith.constant 0 : index
    %4 = vector.load %arg2[%c0_2, %c0_3] : memref<128x256xf32, #tpu.memory_space<vmem>>, vector<128x256xf32>
    %c0_4 = arith.constant 0 : index
    %c0_5 = arith.constant 0 : index
    %5 = vector.load %arg3[%c0_4, %c0_5] : memref<256x64xf32, #tpu.memory_space<vmem>>, vector<256x64xf32>
    %cst = arith.constant dense<0.000000e+00> : vector<128x64xf32>
    %6 = tpu.matmul %4, %5, %cst {dimension_numbers = #tpu.dot_dimension_numbers<[1], [0], [0], [1], [0, 0, 1, 1], [], []>} : vector<128x256xf32>, vector<256x64xf32>, vector<128x64xf32> -> vector<128x64xf32>
    %7 = arith.addf %3, %6 : vector<128x64xf32>
    %c0_6 = arith.constant 0 : index
    %c0_7 = arith.constant 0 : index
    %8 = vector.load %arg6[%c0_6, %c0_7] : memref<128x64xf32, #tpu.memory_space<vmem>>, vector<128x64xf32>
    tpu.vector_store %arg6[%c0_6, %c0_7], %7 {strides = array<i32>} : memref<128x64xf32, #tpu.memory_space<vmem>>, vector<128x64xf32>,
    %c2_i32 = arith.constant 2 : i32
    %9 = arith.cmpi eq, %arg1, %c2_i32 : i32
    %10 = arith.extui %9 : i1 to i32
    %c0_i32_8 = arith.constant 0 : i32
    %11 = arith.cmpi ne, %10, %c0_i32_8 : i32
    scf.if %11 {
      %c0_9 = arith.constant 0 : index
      %c0_10 = arith.constant 0 : index
      %12 = vector.load %arg6[%c0_9, %c0_10] : memref<128x64xf32, #tpu.memory_space<vmem>>, vector<128x64xf32>
      %c0_11 = arith.constant 0 : index
      %c0_12 = arith.constant 0 : index
      %13 = vector.load %arg4[%c0_11, %c0_12] : memref<1x64xf32, #tpu.memory_space<vmem>>, vector<1x64xf32>
      %14 = vector.broadcast %13 : vector<1x64xf32> to vector<128x64xf32>
      %15 = arith.addf %12, %14 : vector<128x64xf32>
      %c0_13 = arith.constant 0 : index
      %c0_14 = arith.constant 0 : index
      %16 = vector.load %arg5[%c0_13, %c0_14] : memref<128x64xf32, #tpu.memory_space<vmem>>, vector<128x64xf32>
      tpu.vector_store %arg5[%c0_13, %c0_14], %15 {strides = array<i32>} : memref<128x64xf32, #tpu.memory_space<vmem>>, vector<128x64xf32>,
    } else {
    }
    return
  }
  func.func @transform_0(%arg0: i32, %arg1: i32) -> (i32, i32) {
    %c0_i32 = arith.constant 0 : i32
    return %arg0, %arg1 : i32, i32
  }
  func.func @transform_1(%arg0: i32, %arg1: i32) -> (i32, i32) {
    %c0_i32 = arith.constant 0 : i32
    %c0_i32_0 = arith.constant 0 : i32
    return %arg1, %c0_i32 : i32, i32
  }
  func.func @transform_2(%arg0: i32, %arg1: i32) -> (i32, i32) {
    %c0_i32 = arith.constant 0 : i32
    %c0_i32_0 = arith.constant 0 : i32
    %c0_i32_1 = arith.constant 0 : i32
    return %c0_i32, %c0_i32_0 : i32, i32
  }
  func.func @transform_3(%arg0: i32, %arg1: i32) -> (i32, i32) {
    %c0_i32 = arith.constant 0 : i32
    %c0_i32_0 = arith.constant 0 : i32
    return %arg0, %c0_i32 : i32, i32
  }
}

module attributes {stable_mosaic.version = 11 : i64} {
  func.func @_pool_kernel(%arg0: i32, %arg1: i32, %arg2: memref<1x8x8x64xf32, #tpu.memory_space<vmem>>, %arg3: memref<1x1x1x8xf32, #tpu.memory_space<vmem>>) attributes {dimension_semantics = [#tpu.dimension_semantics<parallel>, #tpu.dimension_semantics<parallel>], iteration_bounds = array<i64: 2, 1>, scalar_prefetch = 0 : i64, scratch_operands = 0 : i64, tpu.core_type = #tpu.core_type<tc>, window_params = [{transform_indices = @transform_0, window_bounds = array<i64: 1, 8, 8, 64>}, {transform_indices = @transform_1, window_bounds = array<i64: 1, 1, 1, 8>}]} {
    %c0 = arith.constant 0 : index
    %c0_0 = arith.constant 0 : index
    %c0_1 = arith.constant 0 : index
    %c0_2 = arith.constant 0 : index
    %0 = vector.load %arg2[%c0, %c0_0, %c0_1, %c0_2] : memref<1x8x8x64xf32, #tpu.memory_space<vmem>>, vector<1x8x8x64xf32>
    %1 = vector.shape_cast %0 : vector<1x8x8x64xf32> to vector<8x8x64xf32>
    %2 = vector.shape_cast %1 : vector<8x8x64xf32> to vector<8x1x8x64xf32>
    %cst = arith.constant dense<0xFF800000> : vector<8x1x64xf32>
    %3 = vector.multi_reduction <maximumf>, %2, %cst [2] : vector<8x1x8x64xf32> to vector<8x1x64xf32>
    %cst_3 = arith.constant dense<0xFF800000> : vector<1x64xf32>
    %4 = vector.multi_reduction <maximumf>, %3, %cst_3 [0] : vector<8x1x64xf32> to vector<1x64xf32>
    %5 = vector.extract_strided_slice %4 {offsets = [0, 0], sizes = [1, 8], strides = [1, 1]} : vector<1x64xf32> to vector<1x8xf32>
    %6 = vector.extract_strided_slice %4 {offsets = [0, 8], sizes = [1, 8], strides = [1, 1]} : vector<1x64xf32> to vector<1x8xf32>
    %7 = arith.maximumf %5, %6 : vector<1x8xf32>
    %8 = vector.extract_strided_slice %4 {offsets = [0, 16], sizes = [1, 8], strides = [1, 1]} : vector<1x64xf32> to vector<1x8xf32>
    %9 = arith.maximumf %7, %8 : vector<1x8xf32>
    %10 = vector.extract_strided_slice %4 {offsets = [0, 24], sizes = [1, 8], strides = [1, 1]} : vector<1x64xf32> to vector<1x8xf32>
    %11 = arith.maximumf %9, %10 : vector<1x8xf32>
    %12 = vector.extract_strided_slice %4 {offsets = [0, 32], sizes = [1, 8], strides = [1, 1]} : vector<1x64xf32> to vector<1x8xf32>
    %13 = arith.maximumf %11, %12 : vector<1x8xf32>
    %14 = vector.extract_strided_slice %4 {offsets = [0, 40], sizes = [1, 8], strides = [1, 1]} : vector<1x64xf32> to vector<1x8xf32>
    %15 = arith.maximumf %13, %14 : vector<1x8xf32>
    %16 = vector.extract_strided_slice %4 {offsets = [0, 48], sizes = [1, 8], strides = [1, 1]} : vector<1x64xf32> to vector<1x8xf32>
    %17 = arith.maximumf %15, %16 : vector<1x8xf32>
    %18 = vector.extract_strided_slice %4 {offsets = [0, 56], sizes = [1, 8], strides = [1, 1]} : vector<1x64xf32> to vector<1x8xf32>
    %19 = arith.maximumf %17, %18 : vector<1x8xf32>
    %20 = vector.shape_cast %19 : vector<1x8xf32> to vector<1x1x1x8xf32>
    %c0_4 = arith.constant 0 : index
    %c0_5 = arith.constant 0 : index
    %c0_6 = arith.constant 0 : index
    %c0_7 = arith.constant 0 : index
    %21 = vector.load %arg3[%c0_4, %c0_5, %c0_6, %c0_7] : memref<1x1x1x8xf32, #tpu.memory_space<vmem>>, vector<1x1x1x8xf32>
    tpu.vector_store %arg3[%c0_4, %c0_5, %c0_6, %c0_7], %20 {strides = array<i32>} : memref<1x1x1x8xf32, #tpu.memory_space<vmem>>, vector<1x1x1x8xf32>,
    return
  }
  func.func @transform_0(%arg0: i32, %arg1: i32) -> (i32, i32, i32, i32) {
    %c0_i32 = arith.constant 0 : i32
    %c0_i32_0 = arith.constant 0 : i32
    %c0_i32_1 = arith.constant 0 : i32
    return %arg0, %arg1, %c0_i32, %c0_i32_0 : i32, i32, i32, i32
  }
  func.func @transform_1(%arg0: i32, %arg1: i32) -> (i32, i32, i32, i32) {
    %c0_i32 = arith.constant 0 : i32
    %c0_i32_0 = arith.constant 0 : i32
    %c0_i32_1 = arith.constant 0 : i32
    return %arg0, %arg1, %c0_i32, %c0_i32_0 : i32, i32, i32, i32
  }
}

module attributes {stable_mosaic.version = 11 : i64} {
  func.func @_pool_kernel(%arg0: i32, %arg1: i32, %arg2: memref<1x4x4x128xf32, #tpu.memory_space<vmem>>, %arg3: memref<1x1x1x32xf32, #tpu.memory_space<vmem>>) attributes {dimension_semantics = [#tpu.dimension_semantics<parallel>, #tpu.dimension_semantics<parallel>], iteration_bounds = array<i64: 2, 1>, scalar_prefetch = 0 : i64, scratch_operands = 0 : i64, tpu.core_type = #tpu.core_type<tc>, window_params = [{transform_indices = @transform_0, window_bounds = array<i64: 1, 4, 4, 128>}, {transform_indices = @transform_1, window_bounds = array<i64: 1, 1, 1, 32>}]} {
    %c0 = arith.constant 0 : index
    %c0_0 = arith.constant 0 : index
    %c0_1 = arith.constant 0 : index
    %c0_2 = arith.constant 0 : index
    %0 = vector.load %arg2[%c0, %c0_0, %c0_1, %c0_2] : memref<1x4x4x128xf32, #tpu.memory_space<vmem>>, vector<1x4x4x128xf32>
    %1 = vector.shape_cast %0 : vector<1x4x4x128xf32> to vector<4x4x128xf32>
    %2 = vector.shape_cast %1 : vector<4x4x128xf32> to vector<4x1x4x128xf32>
    %cst = arith.constant dense<0xFF800000> : vector<4x1x128xf32>
    %3 = vector.multi_reduction <maximumf>, %2, %cst [2] : vector<4x1x4x128xf32> to vector<4x1x128xf32>
    %cst_3 = arith.constant dense<0xFF800000> : vector<1x128xf32>
    %4 = vector.multi_reduction <maximumf>, %3, %cst_3 [0] : vector<4x1x128xf32> to vector<1x128xf32>
    %5 = vector.extract_strided_slice %4 {offsets = [0, 0], sizes = [1, 32], strides = [1, 1]} : vector<1x128xf32> to vector<1x32xf32>
    %6 = vector.extract_strided_slice %4 {offsets = [0, 32], sizes = [1, 32], strides = [1, 1]} : vector<1x128xf32> to vector<1x32xf32>
    %7 = arith.maximumf %5, %6 : vector<1x32xf32>
    %8 = vector.extract_strided_slice %4 {offsets = [0, 64], sizes = [1, 32], strides = [1, 1]} : vector<1x128xf32> to vector<1x32xf32>
    %9 = arith.maximumf %7, %8 : vector<1x32xf32>
    %10 = vector.extract_strided_slice %4 {offsets = [0, 96], sizes = [1, 32], strides = [1, 1]} : vector<1x128xf32> to vector<1x32xf32>
    %11 = arith.maximumf %9, %10 : vector<1x32xf32>
    %12 = vector.shape_cast %11 : vector<1x32xf32> to vector<1x1x1x32xf32>
    %c0_4 = arith.constant 0 : index
    %c0_5 = arith.constant 0 : index
    %c0_6 = arith.constant 0 : index
    %c0_7 = arith.constant 0 : index
    %13 = vector.load %arg3[%c0_4, %c0_5, %c0_6, %c0_7] : memref<1x1x1x32xf32, #tpu.memory_space<vmem>>, vector<1x1x1x32xf32>
    tpu.vector_store %arg3[%c0_4, %c0_5, %c0_6, %c0_7], %12 {strides = array<i32>} : memref<1x1x1x32xf32, #tpu.memory_space<vmem>>, vector<1x1x1x32xf32>,
    return
  }
  func.func @transform_0(%arg0: i32, %arg1: i32) -> (i32, i32, i32, i32) {
    %c0_i32 = arith.constant 0 : i32
    %c0_i32_0 = arith.constant 0 : i32
    %c0_i32_1 = arith.constant 0 : i32
    return %arg0, %arg1, %c0_i32, %c0_i32_0 : i32, i32, i32, i32
  }
  func.func @transform_1(%arg0: i32, %arg1: i32) -> (i32, i32, i32, i32) {
    %c0_i32 = arith.constant 0 : i32
    %c0_i32_0 = arith.constant 0 : i32
    %c0_i32_1 = arith.constant 0 : i32
    return %arg0, %arg1, %c0_i32, %c0_i32_0 : i32, i32, i32, i32
  }
}

module attributes {stable_mosaic.version = 11 : i64} {
  func.func @_conv_matmul_kernel(%arg0: i32, %arg1: i32, %arg2: memref<32x256xf32, #tpu.memory_space<vmem>>, %arg3: memref<256x128xf32, #tpu.memory_space<vmem>>, %arg4: memref<1x128xf32, #tpu.memory_space<vmem>>, %arg5: memref<32x128xf32, #tpu.memory_space<vmem>>, %arg6: memref<32x128xf32, #tpu.memory_space<vmem>>) attributes {dimension_semantics = [#tpu.dimension_semantics<parallel>, #tpu.dimension_semantics<arbitrary>], iteration_bounds = array<i64: 1, 3>, scalar_prefetch = 0 : i64, scratch_operands = 1 : i64, tpu.core_type = #tpu.core_type<tc>, window_params = [{transform_indices = @transform_0, window_bounds = array<i64: 32, 256>}, {transform_indices = @transform_1, window_bounds = array<i64: 256, 128>}, {pipeline_mode = #tpu.pipeline_mode<synchronous>, transform_indices = @transform_2, window_bounds = array<i64: 1, 128>}, {transform_indices = @transform_3, window_bounds = array<i64: 32, 128>}]} {
    %c0_i32 = arith.constant 0 : i32
    %0 = arith.cmpi eq, %arg1, %c0_i32 : i32
    %1 = arith.extui %0 : i1 to i32
    %c0_i32_0 = arith.constant 0 : i32
    %2 = arith.cmpi ne, %1, %c0_i32_0 : i32
    scf.if %2 {
      %cst_9 = arith.constant 0.000000e+00 : f32
      %12 = vector.broadcast %cst_9 : f32 to vector<32x128xf32>
      %c0_10 = arith.constant 0 : index
      %c0_11 = arith.constant 0 : index
      %13 = vector.load %arg6[%c0_10, %c0_11] : memref<32x128xf32, #tpu.memory_space<vmem>>, vector<32x128xf32>
      tpu.vector_store %arg6[%c0_10, %c0_11], %12 {strides = array<i32>} : memref<32x128xf32, #tpu.memory_space<vmem>>, vector<32x128xf32>,
    } else {
    }
    %c0 = arith.constant 0 : index
    %c0_1 = arith.constant 0 : index
    %3 = vector.load %arg6[%c0, %c0_1] : memref<32x128xf32, #tpu.memory_space<vmem>>, vector<32x128xf32>
    %c0_2 = arith.constant 0 : index
    %c0_3 = arith.constant 0 : index
    %4 = vector.load %arg2[%c0_2, %c0_3] : memref<32x256xf32, #tpu.memory_space<vmem>>, vector<32x256xf32>
    %c0_4 = arith.constant 0 : index
    %c0_5 = arith.constant 0 : index
    %5 = vector.load %arg3[%c0_4, %c0_5] : memref<256x128xf32, #tpu.memory_space<vmem>>, vector<256x128xf32>
    %cst = arith.constant dense<0.000000e+00> : vector<32x128xf32>
    %6 = tpu.matmul %4, %5, %cst {dimension_numbers = #tpu.dot_dimension_numbers<[1], [0], [0], [1], [0, 0, 1, 1], [], []>} : vector<32x256xf32>, vector<256x128xf32>, vector<32x128xf32> -> vector<32x128xf32>
    %7 = arith.addf %3, %6 : vector<32x128xf32>
    %c0_6 = arith.constant 0 : index
    %c0_7 = arith.constant 0 : index
    %8 = vector.load %arg6[%c0_6, %c0_7] : memref<32x128xf32, #tpu.memory_space<vmem>>, vector<32x128xf32>
    tpu.vector_store %arg6[%c0_6, %c0_7], %7 {strides = array<i32>} : memref<32x128xf32, #tpu.memory_space<vmem>>, vector<32x128xf32>,
    %c2_i32 = arith.constant 2 : i32
    %9 = arith.cmpi eq, %arg1, %c2_i32 : i32
    %10 = arith.extui %9 : i1 to i32
    %c0_i32_8 = arith.constant 0 : i32
    %11 = arith.cmpi ne, %10, %c0_i32_8 : i32
    scf.if %11 {
      %c0_9 = arith.constant 0 : index
      %c0_10 = arith.constant 0 : index
      %12 = vector.load %arg6[%c0_9, %c0_10] : memref<32x128xf32, #tpu.memory_space<vmem>>, vector<32x128xf32>
      %c0_11 = arith.constant 0 : index
      %c0_12 = arith.constant 0 : index
      %13 = vector.load %arg4[%c0_11, %c0_12] : memref<1x128xf32, #tpu.memory_space<vmem>>, vector<1x128xf32>
      %14 = vector.broadcast %13 : vector<1x128xf32> to vector<32x128xf32>
      %15 = arith.addf %12, %14 : vector<32x128xf32>
      %c0_13 = arith.constant 0 : index
      %c0_14 = arith.constant 0 : index
      %16 = vector.load %arg5[%c0_13, %c0_14] : memref<32x128xf32, #tpu.memory_space<vmem>>, vector<32x128xf32>
      tpu.vector_store %arg5[%c0_13, %c0_14], %15 {strides = array<i32>} : memref<32x128xf32, #tpu.memory_space<vmem>>, vector<32x128xf32>,
    } else {
    }
    return
  }
  func.func @transform_0(%arg0: i32, %arg1: i32) -> (i32, i32) {
    %c0_i32 = arith.constant 0 : i32
    return %arg0, %arg1 : i32, i32
  }
  func.func @transform_1(%arg0: i32, %arg1: i32) -> (i32, i32) {
    %c0_i32 = arith.constant 0 : i32
    %c0_i32_0 = arith.constant 0 : i32
    return %arg1, %c0_i32 : i32, i32
  }
  func.func @transform_2(%arg0: i32, %arg1: i32) -> (i32, i32) {
    %c0_i32 = arith.constant 0 : i32
    %c0_i32_0 = arith.constant 0 : i32
    %c0_i32_1 = arith.constant 0 : i32
    return %c0_i32, %c0_i32_0 : i32, i32
  }
  func.func @transform_3(%arg0: i32, %arg1: i32) -> (i32, i32) {
    %c0_i32 = arith.constant 0 : i32
    %c0_i32_0 = arith.constant 0 : i32
    return %arg0, %c0_i32 : i32, i32
  }
}

module attributes {stable_mosaic.version = 11 : i64} {
  func.func @_conv_matmul_kernel(%arg0: i32, %arg1: i32, %arg2: memref<8x256xf32, #tpu.memory_space<vmem>>, %arg3: memref<256x256xf32, #tpu.memory_space<vmem>>, %arg4: memref<1x256xf32, #tpu.memory_space<vmem>>, %arg5: memref<8x256xf32, #tpu.memory_space<vmem>>, %arg6: memref<8x256xf32, #tpu.memory_space<vmem>>) attributes {dimension_semantics = [#tpu.dimension_semantics<parallel>, #tpu.dimension_semantics<arbitrary>], iteration_bounds = array<i64: 1, 5>, scalar_prefetch = 0 : i64, scratch_operands = 1 : i64, tpu.core_type = #tpu.core_type<tc>, window_params = [{transform_indices = @transform_0, window_bounds = array<i64: 8, 256>}, {transform_indices = @transform_1, window_bounds = array<i64: 256, 256>}, {pipeline_mode = #tpu.pipeline_mode<synchronous>, transform_indices = @transform_2, window_bounds = array<i64: 1, 256>}, {transform_indices = @transform_3, window_bounds = array<i64: 8, 256>}]} {
    %c0_i32 = arith.constant 0 : i32
    %0 = arith.cmpi eq, %arg1, %c0_i32 : i32
    %1 = arith.extui %0 : i1 to i32
    %c0_i32_0 = arith.constant 0 : i32
    %2 = arith.cmpi ne, %1, %c0_i32_0 : i32
    scf.if %2 {
      %cst_9 = arith.constant 0.000000e+00 : f32
      %12 = vector.broadcast %cst_9 : f32 to vector<8x256xf32>
      %c0_10 = arith.constant 0 : index
      %c0_11 = arith.constant 0 : index
      %13 = vector.load %arg6[%c0_10, %c0_11] : memref<8x256xf32, #tpu.memory_space<vmem>>, vector<8x256xf32>
      tpu.vector_store %arg6[%c0_10, %c0_11], %12 {strides = array<i32>} : memref<8x256xf32, #tpu.memory_space<vmem>>, vector<8x256xf32>,
    } else {
    }
    %c0 = arith.constant 0 : index
    %c0_1 = arith.constant 0 : index
    %3 = vector.load %arg6[%c0, %c0_1] : memref<8x256xf32, #tpu.memory_space<vmem>>, vector<8x256xf32>
    %c0_2 = arith.constant 0 : index
    %c0_3 = arith.constant 0 : index
    %4 = vector.load %arg2[%c0_2, %c0_3] : memref<8x256xf32, #tpu.memory_space<vmem>>, vector<8x256xf32>
    %c0_4 = arith.constant 0 : index
    %c0_5 = arith.constant 0 : index
    %5 = vector.load %arg3[%c0_4, %c0_5] : memref<256x256xf32, #tpu.memory_space<vmem>>, vector<256x256xf32>
    %cst = arith.constant dense<0.000000e+00> : vector<8x256xf32>
    %6 = tpu.matmul %4, %5, %cst {dimension_numbers = #tpu.dot_dimension_numbers<[1], [0], [0], [1], [0, 0, 1, 1], [], []>} : vector<8x256xf32>, vector<256x256xf32>, vector<8x256xf32> -> vector<8x256xf32>
    %7 = arith.addf %3, %6 : vector<8x256xf32>
    %c0_6 = arith.constant 0 : index
    %c0_7 = arith.constant 0 : index
    %8 = vector.load %arg6[%c0_6, %c0_7] : memref<8x256xf32, #tpu.memory_space<vmem>>, vector<8x256xf32>
    tpu.vector_store %arg6[%c0_6, %c0_7], %7 {strides = array<i32>} : memref<8x256xf32, #tpu.memory_space<vmem>>, vector<8x256xf32>,
    %c4_i32 = arith.constant 4 : i32
    %9 = arith.cmpi eq, %arg1, %c4_i32 : i32
    %10 = arith.extui %9 : i1 to i32
    %c0_i32_8 = arith.constant 0 : i32
    %11 = arith.cmpi ne, %10, %c0_i32_8 : i32
    scf.if %11 {
      %c0_9 = arith.constant 0 : index
      %c0_10 = arith.constant 0 : index
      %12 = vector.load %arg6[%c0_9, %c0_10] : memref<8x256xf32, #tpu.memory_space<vmem>>, vector<8x256xf32>
      %c0_11 = arith.constant 0 : index
      %c0_12 = arith.constant 0 : index
      %13 = vector.load %arg4[%c0_11, %c0_12] : memref<1x256xf32, #tpu.memory_space<vmem>>, vector<1x256xf32>
      %14 = vector.broadcast %13 : vector<1x256xf32> to vector<8x256xf32>
      %15 = arith.addf %12, %14 : vector<8x256xf32>
      %c0_13 = arith.constant 0 : index
      %c0_14 = arith.constant 0 : index
      %16 = vector.load %arg5[%c0_13, %c0_14] : memref<8x256xf32, #tpu.memory_space<vmem>>, vector<8x256xf32>
      tpu.vector_store %arg5[%c0_13, %c0_14], %15 {strides = array<i32>} : memref<8x256xf32, #tpu.memory_space<vmem>>, vector<8x256xf32>,
    } else {
    }
    return
  }
  func.func @transform_0(%arg0: i32, %arg1: i32) -> (i32, i32) {
    %c0_i32 = arith.constant 0 : i32
    return %arg0, %arg1 : i32, i32
  }
  func.func @transform_1(%arg0: i32, %arg1: i32) -> (i32, i32) {
    %c0_i32 = arith.constant 0 : i32
    %c0_i32_0 = arith.constant 0 : i32
    return %arg1, %c0_i32 : i32, i32
  }
  func.func @transform_2(%arg0: i32, %arg1: i32) -> (i32, i32) {
    %c0_i32 = arith.constant 0 : i32
    %c0_i32_0 = arith.constant 0 : i32
    %c0_i32_1 = arith.constant 0 : i32
    return %c0_i32, %c0_i32_0 : i32, i32
  }
  func.func @transform_3(%arg0: i32, %arg1: i32) -> (i32, i32) {
    %c0_i32 = arith.constant 0 : i32
    %c0_i32_0 = arith.constant 0 : i32
    return %arg0, %c0_i32 : i32, i32
  }
}

module attributes {stable_mosaic.version = 11 : i64} {
  func.func @_pool_kernel(%arg0: i32, %arg1: i32, %arg2: memref<1x2x2x256xf32, #tpu.memory_space<vmem>>, %arg3: memref<1x1x1x128xf32, #tpu.memory_space<vmem>>) attributes {dimension_semantics = [#tpu.dimension_semantics<parallel>, #tpu.dimension_semantics<parallel>], iteration_bounds = array<i64: 2, 1>, scalar_prefetch = 0 : i64, scratch_operands = 0 : i64, tpu.core_type = #tpu.core_type<tc>, window_params = [{transform_indices = @transform_0, window_bounds = array<i64: 1, 2, 2, 256>}, {transform_indices = @transform_1, window_bounds = array<i64: 1, 1, 1, 128>}]} {
    %c0 = arith.constant 0 : index
    %c0_0 = arith.constant 0 : index
    %c0_1 = arith.constant 0 : index
    %c0_2 = arith.constant 0 : index
    %0 = vector.load %arg2[%c0, %c0_0, %c0_1, %c0_2] : memref<1x2x2x256xf32, #tpu.memory_space<vmem>>, vector<1x2x2x256xf32>
    %1 = vector.shape_cast %0 : vector<1x2x2x256xf32> to vector<2x2x256xf32>
    %2 = vector.shape_cast %1 : vector<2x2x256xf32> to vector<2x1x2x256xf32>
    %cst = arith.constant dense<0xFF800000> : vector<2x1x256xf32>
    %3 = vector.multi_reduction <maximumf>, %2, %cst [2] : vector<2x1x2x256xf32> to vector<2x1x256xf32>
    %cst_3 = arith.constant dense<0xFF800000> : vector<1x256xf32>
    %4 = vector.multi_reduction <maximumf>, %3, %cst_3 [0] : vector<2x1x256xf32> to vector<1x256xf32>
    %5 = vector.extract_strided_slice %4 {offsets = [0, 0], sizes = [1, 128], strides = [1, 1]} : vector<1x256xf32> to vector<1x128xf32>
    %6 = vector.extract_strided_slice %4 {offsets = [0, 128], sizes = [1, 128], strides = [1, 1]} : vector<1x256xf32> to vector<1x128xf32>
    %7 = arith.maximumf %5, %6 : vector<1x128xf32>
    %8 = vector.shape_cast %7 : vector<1x128xf32> to vector<1x1x1x128xf32>
    %c0_4 = arith.constant 0 : index
    %c0_5 = arith.constant 0 : index
    %c0_6 = arith.constant 0 : index
    %c0_7 = arith.constant 0 : index
    %9 = vector.load %arg3[%c0_4, %c0_5, %c0_6, %c0_7] : memref<1x1x1x128xf32, #tpu.memory_space<vmem>>, vector<1x1x1x128xf32>
    tpu.vector_store %arg3[%c0_4, %c0_5, %c0_6, %c0_7], %8 {strides = array<i32>} : memref<1x1x1x128xf32, #tpu.memory_space<vmem>>, vector<1x1x1x128xf32>,
    return
  }
  func.func @transform_0(%arg0: i32, %arg1: i32) -> (i32, i32, i32, i32) {
    %c0_i32 = arith.constant 0 : i32
    %c0_i32_0 = arith.constant 0 : i32
    %c0_i32_1 = arith.constant 0 : i32
    return %arg0, %arg1, %c0_i32, %c0_i32_0 : i32, i32, i32, i32
  }
  func.func @transform_1(%arg0: i32, %arg1: i32) -> (i32, i32, i32, i32) {
    %c0_i32 = arith.constant 0 : i32
    %c0_i32_0 = arith.constant 0 : i32
    %c0_i32_1 = arith.constant 0 : i32
    return %arg0, %arg1, %c0_i32, %c0_i32_0 : i32, i32, i32, i32
  }
}

</mosaic_0001>

<bundles_post_ra>
// kernel: feature_extractor.7
= control target key start
LH: loop header
LB: loop body
LE: loop exit
PB: predicated region body
PF: predicated region fallthrough
CT: control target
= control target key end

     0   :  { %s1120_s12 = smov 0   ;;  %s1122_s13 = smov 0   ;;  %s1418_s0 = inlined_call_operand.vmem [shape: f32[512,27], index: 0, kind: input, shape index: {}]   ;;  %s1419_s1 = inlined_call_operand.vmem [shape: f32[27,64], index: 1, kind: input, shape index: {}]   ;;  %s1420_s2 = inlined_call_operand.vmem [shape: f32[1,64], index: 2, kind: input, shape index: {}]   ;;  %s1421_s3 = inlined_call_operand.vmem [shape: f32[512,64], index: 3, kind: output, shape index: {}]  }
   0x1   :  { %s1124_s14 = smov 0  }
   0x2 LB: > { %s25_s15 = sadd.s32 1, %s1093_s13  ;;  %p909_p0 = scmp.ge.s32.totalorder %s1097_s14, 1  ;;  %s1097_s14 = sphi %s1124_s14, %s13_s14   ;;  %s1093_s13 = sphi %s1122_s13, %s1424_s13   ;;  %s1089_s12 = sphi %s1120_s12, %s1423_s12  }
   0x3   : > { %p27_p1 = scmp.ge.s32.totalorder %s25_s15, 2  ;;  %p166_p2 = scmp.lt.s32.totalorder %s1097_s14, 3 }
   0x5   : > { %s1426_s15 = smov (%p27_p1, %s25_s15), 0  ;;  %p167_p3 = pnand %p909_p0, %p166_p2 }
   0x6   : > { %s910_s20 = sshll.u32 (!%p167_p3), %s1089_s12, 5 }
   0x7   : > { %170 = sbr.rel (%p167_p3) target bundleno = 259 (0x103), region = 32  ;;  %p1149_p4 = scmp.lt.s32.totalorder (!%p167_p3), %s910_s20, 63 }
   0xc   : > { %v323_v0 = vld [vmem:[%s1419_s1 + $0x18] sm:$0x7]  ;;  %vm421_vm0 = vcmask 1042432   ;;  %v322_v1 = vld [vmem:[%s1419_s1 + $0x10] sm:$0xff]  ;;  %vm223_vm1 = vcmask 523264   ;;  %v321_v2 = vld [vmem:[%s1419_s1 + $0x8] sm:$0xff] }
   0xd   : > { %986 = vmatprep.subr.msk.mxu0 %vm421_vm0, %v323_v0  ;;  %1042 = vmatprep.subr.msk.mxu1 %vm421_vm0, %v323_v0  ;;  %v1099_v3 = vmov 0.0   ;;  %s1428_s20 = smov (!%p1149_p4, %s910_s20), 63  ;;  %v320_v4 = vld [vmem:[%s1419_s1] sm:$0xff]  ;;  %vm324_vm2 = vcmask 220160  }
   0xe   : > { %987 = vmatpush3.msk.msra.mxu0 %vm421_vm0, %v323_v0  ;;  %1046 = vmatpush3.msk.msra.mxu1 %vm421_vm0, %v323_v0  ;;  %225 = vst.msk [vmem:[#allocation2 + $0x8] sm:$0xff] %vm223_vm1, %v1099_v3  ;;  %224 = vst.msk [vmem:[#allocation2] sm:$0xff] %vm223_vm1, %v1099_v3  ;;  %s911_s26 = sshll.u32 %s1428_s20, 3  ;;  %v1278_v63 = vld [vmem:[%s1420_s2] ss:$0 sm:$0xff] }
   0xf   : > { %226 = vst.msk [vmem:[#allocation2 + $0x10] sm:$0xff] %vm223_vm1, %v1099_v3  ;;  %227 = vst.msk [vmem:[#allocation2 + $0x18] sm:$0xff] %vm223_vm1, %v1099_v3  ;;  %988 = vmatprep.subr.mxu0 %v322_v1  ;;  %1043 = vmatprep.subr.mxu1 %v322_v1  ;;  %s1203_s29 = scalar_lea.vmem %s1418_s0, %s911_s26  ;;  %s1287_s7 = scalar_lea.vmem %s1421_s3, %s911_s26 }
  0x10   : > { %228 = vst.msk [vmem:[#allocation2 + $0x20] sm:$0xff] %vm223_vm1, %v1099_v3  ;;  %229 = vst.msk [vmem:[#allocation2 + $0x28] sm:$0xff] %vm223_vm1, %v1099_v3  ;;  %989 = vmatpush3.msra.mxu0 %v322_v1  ;;  %1047 = vmatpush3.msra.mxu1 %v322_v1  ;;  %v288_v5 = vld [vmem:[%s1203_s29] sm:$0xff]  ;;  %v289_v7 = vld [vmem:[%s1203_s29 + $0x8] sm:$0xff] }
  0x11   : > { %230 = vst.msk [vmem:[#allocation2 + $0x30] sm:$0xff] %vm223_vm1, %v1099_v3  ;;  %231 = vst.msk [vmem:[#allocation2 + $0x38] sm:$0xff] %vm223_vm1, %v1099_v3  ;;  %990 = vmatprep.subr.mxu0 %v321_v2  ;;  %1044 = vmatprep.subr.mxu1 %v321_v2  ;;  %v304_v6 = vld [vmem:[%s1203_s29 + $0x80] sm:$0xff]  ;;  %v305_v8 = vld [vmem:[%s1203_s29 + $0x88] sm:$0xff] }
  0x12   : > { %232 = vst.msk [vmem:[#allocation2 + $0x40] sm:$0xff] %vm223_vm1, %v1099_v3  ;;  %233 = vst.msk [vmem:[#allocation2 + $0x48] sm:$0xff] %vm223_vm1, %v1099_v3  ;;  %991 = vmatpush3.msra.mxu0 %v321_v2  ;;  %1048 = vmatpush3.msra.mxu1 %v321_v2  ;;  %v290_v9 = vld [vmem:[%s1203_s29 + $0x10] sm:$0xff]  ;;  %v291_v11 = vld [vmem:[%s1203_s29 + $0x18] sm:$0xff] }
  0x13   : > { %234 = vst.msk [vmem:[#allocation2 + $0x50] sm:$0xff] %vm223_vm1, %v1099_v3  ;;  %235 = vst.msk [vmem:[#allocation2 + $0x58] sm:$0xff] %vm223_vm1, %v1099_v3  ;;  %992 = vmatprep.subr.mxu0 %v320_v4  ;;  %1045 = vmatprep.subr.mxu1 %v320_v4  ;;  %v306_v10 = vld [vmem:[%s1203_s29 + $0x90] sm:$0xff]  ;;  %v307_v12 = vld [vmem:[%s1203_s29 + $0x98] sm:$0xff] }
  0x14   : > { %236 = vst.msk [vmem:[#allocation2 + $0x60] sm:$0xff] %vm223_vm1, %v1099_v3  ;;  %237 = vst.msk [vmem:[#allocation2 + $0x68] sm:$0xff] %vm223_vm1, %v1099_v3  ;;  %993 = vmatpush3.msra.mxu0 %v320_v4  ;;  %1049 = vmatpush3.msra.mxu1 %v320_v4  ;;  %v292_v13 = vld [vmem:[%s1203_s29 + $0x20] sm:$0xff]  ;;  %v293_v15 = vld [vmem:[%s1203_s29 + $0x28] sm:$0xff] }
  0x15   : > { %238 = vst.msk [vmem:[#allocation2 + $0x70] sm:$0xff] %vm223_vm1, %v1099_v3  ;;  %239 = vst.msk [vmem:[#allocation2 + $0x78] sm:$0xff] %vm223_vm1, %v1099_v3  ;;  %994 = vmatprep.mubr.msk.f32.mxu0 %vm324_vm2, %v288_v5  ;;  %1018 = vmatprep.mubr.msk.f32.mxu1 %vm324_vm2, %v304_v6  ;;  %v308_v14 = vld [vmem:[%s1203_s29 + $0xa0] sm:$0xff]  ;;  %v309_v16 = vld [vmem:[%s1203_s29 + $0xa8] sm:$0xff] }
  0x16   : > { %240 = vst.msk [vmem:[#allocation2 + $0x80] sm:$0xff] %vm223_vm1, %v1099_v3  ;;  %241 = vst.msk [vmem:[#allocation2 + $0x88] sm:$0xff] %vm223_vm1, %v1099_v3  ;;  %995 = vmatmul.mubr.msk.f32.vlgmr.msra.gmra.mxu0 %vm324_vm2, %v289_v7  ;;  %1019 = vmatmul.mubr.msk.f32.vlgmr.msra.gmra.mxu1 %vm324_vm2, %v305_v8  ;;  %v294_v17 = vld [vmem:[%s1203_s29 + $0x30] sm:$0xff]  ;;  %v295_v19 = vld [vmem:[%s1203_s29 + $0x38] sm:$0xff] }
  0x17   : > { %242 = vst.msk [vmem:[#allocation2 + $0x90] sm:$0xff] %vm223_vm1, %v1099_v3  ;;  %243 = vst.msk [vmem:[#allocation2 + $0x98] sm:$0xff] %vm223_vm1, %v1099_v3  ;;  %997 = vmatprep.mubr.msk.f32.mxu0 %vm324_vm2, %v290_v9  ;;  %1021 = vmatprep.mubr.msk.f32.mxu1 %vm324_vm2, %v306_v10  ;;  %v310_v18 = vld [vmem:[%s1203_s29 + $0xb0] sm:$0xff]  ;;  %v311_v20 = vld [vmem:[%s1203_s29 + $0xb8] sm:$0xff] }
  0x18   : > { %244 = vst.msk [vmem:[#allocation2 + $0xa0] sm:$0xff] %vm223_vm1, %v1099_v3  ;;  %245 = vst.msk [vmem:[#allocation2 + $0xa8] sm:$0xff] %vm223_vm1, %v1099_v3  ;;  %v296_v21 = vld [vmem:[%s1203_s29 + $0x40] sm:$0xff]  ;;  %v297_v23 = vld [vmem:[%s1203_s29 + $0x48] sm:$0xff] }
  0x19   : > { %246 = vst.msk [vmem:[#allocation2 + $0xb0] sm:$0xff] %vm223_vm1, %v1099_v3  ;;  %247 = vst.msk [vmem:[#allocation2 + $0xb8] sm:$0xff] %vm223_vm1, %v1099_v3  ;;  %v312_v22 = vld [vmem:[%s1203_s29 + $0xc0] sm:$0xff]  ;;  %v313_v24 = vld [vmem:[%s1203_s29 + $0xc8] sm:$0xff] }
  0x1a   : > { %248 = vst.msk [vmem:[#allocation2 + $0xc0] sm:$0xff] %vm223_vm1, %v1099_v3  ;;  %249 = vst.msk [vmem:[#allocation2 + $0xc8] sm:$0xff] %vm223_vm1, %v1099_v3  ;;  %998 = vmatmul.mubr.msk.f32.gmra.mxu0 %vm324_vm2, %v291_v11  ;;  %1022 = vmatmul.mubr.msk.f32.gmra.mxu1 %vm324_vm2, %v307_v12  ;;  %v298_v25 = vld [vmem:[%s1203_s29 + $0x50] sm:$0xff]  ;;  %v299_v27 = vld [vmem:[%s1203_s29 + $0x58] sm:$0xff] }
  0x1b   : > { %250 = vst.msk [vmem:[#allocation2 + $0xd0] sm:$0xff] %vm223_vm1, %v1099_v3  ;;  %251 = vst.msk [vmem:[#allocation2 + $0xd8] sm:$0xff] %vm223_vm1, %v1099_v3  ;;  %1000 = vmatprep.mubr.msk.f32.mxu0 %vm324_vm2, %v292_v13  ;;  %1024 = vmatprep.mubr.msk.f32.mxu1 %vm324_vm2, %v308_v14  ;;  %v314_v26 = vld [vmem:[%s1203_s29 + $0xd0] sm:$0xff]  ;;  %v315_v28 = vld [vmem:[%s1203_s29 + $0xd8] sm:$0xff] }
  0x1c   : > { %252 = vst.msk [vmem:[#allocation2 + $0xe0] sm:$0xff] %vm223_vm1, %v1099_v3  ;;  %253 = vst.msk [vmem:[#allocation2 + $0xe8] sm:$0xff] %vm223_vm1, %v1099_v3  ;;  %v300_v29 = vld [vmem:[%s1203_s29 + $0x60] sm:$0xff]  ;;  %v301_v31 = vld [vmem:[%s1203_s29 + $0x68] sm:$0xff] }
  0x1d   : > { %254 = vst.msk [vmem:[#allocation2 + $0xf0] sm:$0xff] %vm223_vm1, %v1099_v3  ;;  %255 = vst.msk [vmem:[#allocation2 + $0xf8] sm:$0xff] %vm223_vm1, %v1099_v3  ;;  %v316_v30 = vld [vmem:[%s1203_s29 + $0xe0] sm:$0xff]  ;;  %v317_v32 = vld [vmem:[%s1203_s29 + $0xe8] sm:$0xff] }
  0x1e   : > { %1001 = vmatmul.mubr.msk.f32.gmra.mxu0 %vm324_vm2, %v293_v15  ;;  %1025 = vmatmul.mubr.msk.f32.gmra.mxu1 %vm324_vm2, %v309_v16  ;;  %v302_v33 = vld [vmem:[%s1203_s29 + $0x70] sm:$0xff]  ;;  %v303_v35 = vld [vmem:[%s1203_s29 + $0x78] sm:$0xff]  ;;  %v257_v37 = vld [vmem:[#allocation2 + $0x8] sm:$0xff] }
  0x1f   : > { %1003 = vmatprep.mubr.msk.f32.mxu0 %vm324_vm2, %v294_v17  ;;  %1027 = vmatprep.mubr.msk.f32.mxu1 %vm324_vm2, %v310_v18  ;;  %v318_v34 = vld [vmem:[%s1203_s29 + $0xf0] sm:$0xff]  ;;  %v319_v36 = vld [vmem:[%s1203_s29 + $0xf8] sm:$0xff]  ;;  %v273_v38 = vld [vmem:[#allocation2 + $0x88] sm:$0xff] }
  0x20   : > { %v256_v41 = vld [vmem:[#allocation2] sm:$0xff]  ;;  %v259_v47 = vld [vmem:[#allocation2 + $0x18] sm:$0xff]  ;;  %v258_v53 = vld [vmem:[#allocation2 + $0x10] sm:$0xff] }
  0x21   : > { %v272_v42 = vld [vmem:[#allocation2 + $0x80] sm:$0xff]  ;;  %v275_v48 = vld [vmem:[#allocation2 + $0x98] sm:$0xff]  ;;  %v274_v54 = vld [vmem:[#allocation2 + $0x90] sm:$0xff] }
  0x22   : > { %1004 = vmatmul.mubr.msk.f32.gmra.mxu0 %vm324_vm2, %v295_v19  ;;  %1028 = vmatmul.mubr.msk.f32.gmra.mxu1 %vm324_vm2, %v311_v20  ;;  %v261_v59 = vld [vmem:[#allocation2 + $0x28] sm:$0xff]  ;;  %v260_v2 = vld [vmem:[#allocation2 + $0x20] sm:$0xff]  ;;  %v263_v6 = vld [vmem:[#allocation2 + $0x38] sm:$0xff] }
  0x23   : > { %1006 = vmatprep.mubr.msk.f32.mxu0 %vm324_vm2, %v296_v21  ;;  %1030 = vmatprep.mubr.msk.f32.mxu1 %vm324_vm2, %v312_v22  ;;  %v277_v60 = vld [vmem:[#allocation2 + $0xa8] sm:$0xff]  ;;  %v276_v3 = vld [vmem:[#allocation2 + $0xa0] sm:$0xff]  ;;  %v279_v11 = vld [vmem:[#allocation2 + $0xb8] sm:$0xff] }
  0x24   : > { %v262_v16 = vld [vmem:[#allocation2 + $0x30] sm:$0xff] }
  0x25   : > { %v278_v21 = vld [vmem:[#allocation2 + $0xb0] sm:$0xff] }
  0x26   : > { %1007 = vmatmul.mubr.msk.f32.gmra.mxu0 %vm324_vm2, %v297_v23  ;;  %1031 = vmatmul.mubr.msk.f32.gmra.mxu1 %vm324_vm2, %v313_v24 }
  0x27   : > { %1009 = vmatprep.mubr.msk.f32.mxu0 %vm324_vm2, %v298_v25  ;;  %1033 = vmatprep.mubr.msk.f32.mxu1 %vm324_vm2, %v314_v26  ;;  %v265_v26 = vld [vmem:[#allocation2 + $0x48] sm:$0xff] }
  0x2a   : > { %1010 = vmatmul.mubr.msk.f32.gmra.mxu0 %vm324_vm2, %v299_v27  ;;  %1034 = vmatmul.mubr.msk.f32.gmra.mxu1 %vm324_vm2, %v315_v28 }
  0x2b   : > { %1012 = vmatprep.mubr.msk.f32.mxu0 %vm324_vm2, %v300_v29  ;;  %1036 = vmatprep.mubr.msk.f32.mxu1 %vm324_vm2, %v316_v30 }
  0x2e   : > { %1013 = vmatmul.mubr.msk.f32.gmra.mxu0 %vm324_vm2, %v301_v31  ;;  %1037 = vmatmul.mubr.msk.f32.gmra.mxu1 %vm324_vm2, %v317_v32  ;;  %v281_v31 = vld [vmem:[#allocation2 + $0xc8] sm:$0xff] }
  0x2f   : > { %1015 = vmatprep.mubr.msk.f32.mxu0 %vm324_vm2, %v302_v33  ;;  %1039 = vmatprep.mubr.msk.f32.mxu1 %vm324_vm2, %v318_v34 }
  0x32   : > { %1016 = vmatmul.mubr.msk.f32.gmra.mxu0 %vm324_vm2, %v303_v35  ;;  %1040 = vmatmul.mubr.msk.f32.gmra.mxu1 %vm324_vm2, %v319_v36  ;;  %v264_v36 = vld [vmem:[#allocation2 + $0x40] sm:$0xff] }
  0xd6   : > { %v996_v39 = vpop.f32.mrf.mxu0  ;;  %v1020_v40 = vpop.f32.mrf.mxu1 }
  0xd7   : > { %v651_v43 = vadd.f32 %v996_v39, %v257_v37  ;;  %v667_v44 = vadd.f32 %v1020_v40, %v273_v38 }
  0xd8   : > { %v491_v45 = vpop.f32.mrf.mxu0  ;;  %v571_v46 = vpop.f32.mrf.mxu1 }
  0xd9   : > { %684 = vst.msk [vmem:[#allocation2 + $0x8] sm:$0xff] %vm223_vm1, %v651_v43  ;;  %700 = vst.msk [vmem:[#allocation2 + $0x88] sm:$0xff] %vm223_vm1, %v667_v44  ;;  %v650_v49 = vadd.f32 %v491_v45, %v256_v41  ;;  %v666_v50 = vadd.f32 %v571_v46, %v272_v42  ;;  %v280_v41 = vld [vmem:[#allocation2 + $0xc0] sm:$0xff]  ;;  %v267_v46 = vld [vmem:[#allocation2 + $0x58] sm:$0xff] }
  0xda   : > { %v999_v51 = vpop.f32.mrf.mxu0  ;;  %v1023_v52 = vpop.f32.mrf.mxu1 }
  0xdb   : > { %683 = vst.msk [vmem:[#allocation2] sm:$0xff] %vm223_vm1, %v650_v49  ;;  %699 = vst.msk [vmem:[#allocation2 + $0x80] sm:$0xff] %vm223_vm1, %v666_v50  ;;  %v653_v55 = vadd.f32 %v999_v51, %v259_v47  ;;  %v669_v56 = vadd.f32 %v1023_v52, %v275_v48  ;;  %v283_v51 = vld [vmem:[#allocation2 + $0xd8] sm:$0xff] }
  0xdc   : > { %v501_v57 = vpop.f32.mrf.mxu0  ;;  %v581_v58 = vpop.f32.mrf.mxu1 }
  0xdd   : > { %686 = vst.msk [vmem:[#allocation2 + $0x18] sm:$0xff] %vm223_vm1, %v653_v55  ;;  %702 = vst.msk [vmem:[#allocation2 + $0x98] sm:$0xff] %vm223_vm1, %v669_v56  ;;  %v652_v61 = vadd.f32 %v501_v57, %v258_v53  ;;  %v668_v62 = vadd.f32 %v581_v58, %v274_v54  ;;  %v266_v56 = vld [vmem:[#allocation2 + $0x50] sm:$0xff] }
  0xde   : > { %v1002_v0 = vpop.f32.mrf.mxu0  ;;  %v1026_v1 = vpop.f32.mrf.mxu1 }
  0xdf   : > { %685 = vst.msk [vmem:[#allocation2 + $0x10] sm:$0xff] %vm223_vm1, %v652_v61  ;;  %701 = vst.msk [vmem:[#allocation2 + $0x90] sm:$0xff] %vm223_vm1, %v668_v62  ;;  %v655_v4 = vadd.f32 %v1002_v0, %v261_v59  ;;  %v671_v5 = vadd.f32 %v1026_v1, %v277_v60  ;;  %v282_v61 = vld [vmem:[#allocation2 + $0xd0] sm:$0xff] }
  0xe0   : > { %v719_v7 = vld [vmem:[#allocation2 + $0x8] sm:$0xff]  ;;  %v511_v9 = vpop.f32.mrf.mxu0  ;;  %v591_v10 = vpop.f32.mrf.mxu1 }
  0xe1   : > { %v735_v8 = vld [vmem:[#allocation2 + $0x88] sm:$0xff]  ;;  %v758_v12 = vadd.f32 %v1278_v63, %v719_v7  ;;  %688 = vst.msk [vmem:[#allocation2 + $0x28] sm:$0xff] %vm223_vm1, %v655_v4  ;;  %704 = vst.msk [vmem:[#allocation2 + $0xa8] sm:$0xff] %vm223_vm1, %v671_v5  ;;  %v654_v14 = vadd.f32 %v511_v9, %v260_v2  ;;  %v670_v15 = vadd.f32 %v591_v10, %v276_v3 }
  0xe2   : > { %v774_v13 = vadd.f32 %v1278_v63, %v735_v8  ;;  %v718_v17 = vld [vmem:[#allocation2] sm:$0xff]  ;;  %v1005_v19 = vpop.f32.mrf.mxu0  ;;  %v1029_v20 = vpop.f32.mrf.mxu1  ;;  %v269_v3 = vld [vmem:[#allocation2 + $0x68] sm:$0xff] }
  0xe3   : > { %v734_v18 = vld [vmem:[#allocation2 + $0x80] sm:$0xff]  ;;  %790 = vst.msk [vmem:[%s1287_s7 + $0x8] sm:$0xff] %vm223_vm1, %v758_v12  ;;  %v757_v22 = vadd.f32 %v1278_v63, %v718_v17  ;;  %687 = vst.msk [vmem:[#allocation2 + $0x20] sm:$0xff] %vm223_vm1, %v654_v14  ;;  %v657_v24 = vadd.f32 %v1005_v19, %v263_v6  ;;  %v673_v25 = vadd.f32 %v1029_v20, %v279_v11  ;;  %v285_v8 = vld [vmem:[#allocation2 + $0xe8] sm:$0xff] }
  0xe4   : > { %806 = vst.msk [vmem:[%s1287_s7 + $0x88] sm:$0xff] %vm223_vm1, %v774_v13  ;;  %v773_v23 = vadd.f32 %v1278_v63, %v734_v18  ;;  %703 = vst.msk [vmem:[#allocation2 + $0xa0] sm:$0xff] %vm223_vm1, %v670_v15  ;;  %v721_v27 = vld [vmem:[#allocation2 + $0x18] sm:$0xff]  ;;  %v521_v29 = vpop.f32.mrf.mxu0  ;;  %v601_v30 = vpop.f32.mrf.mxu1  ;;  %v268_v13 = vld [vmem:[#allocation2 + $0x60] sm:$0xff] }
  0xe5   : > { %v737_v28 = vld [vmem:[#allocation2 + $0x98] sm:$0xff]  ;;  %789 = vst.msk [vmem:[%s1287_s7] sm:$0xff] %vm223_vm1, %v757_v22  ;;  %v760_v32 = vadd.f32 %v1278_v63, %v721_v27  ;;  %690 = vst.msk [vmem:[#allocation2 + $0x38] sm:$0xff] %vm223_vm1, %v657_v24  ;;  %v656_v34 = vadd.f32 %v521_v29, %v262_v16  ;;  %v672_v35 = vadd.f32 %v601_v30, %v278_v21  ;;  %v284_v18 = vld [vmem:[#allocation2 + $0xe0] sm:$0xff] }
  0xe6   : > { %805 = vst.msk [vmem:[%s1287_s7 + $0x80] sm:$0xff] %vm223_vm1, %v773_v23  ;;  %v776_v33 = vadd.f32 %v1278_v63, %v737_v28  ;;  %706 = vst.msk [vmem:[#allocation2 + $0xb8] sm:$0xff] %vm223_vm1, %v673_v25  ;;  %v720_v37 = vld [vmem:[#allocation2 + $0x10] sm:$0xff]  ;;  %v1008_v39 = vpop.f32.mrf.mxu0  ;;  %v1032_v40 = vpop.f32.mrf.mxu1  ;;  %v271_v23 = vld [vmem:[#allocation2 + $0x78] sm:$0xff] }
  0xe7   : > { %v736_v38 = vld [vmem:[#allocation2 + $0x90] sm:$0xff]  ;;  %792 = vst.msk [vmem:[%s1287_s7 + $0x18] sm:$0xff] %vm223_vm1, %v760_v32  ;;  %v759_v42 = vadd.f32 %v1278_v63, %v720_v37  ;;  %689 = vst.msk [vmem:[#allocation2 + $0x30] sm:$0xff] %vm223_vm1, %v656_v34  ;;  %v659_v44 = vadd.f32 %v1008_v39, %v265_v26  ;;  %v675_v45 = vadd.f32 %v1032_v40, %v281_v31  ;;  %v287_v28 = vld [vmem:[#allocation2 + $0xf8] sm:$0xff] }
  0xe8   : > { %808 = vst.msk [vmem:[%s1287_s7 + $0x98] sm:$0xff] %vm223_vm1, %v776_v33  ;;  %v775_v43 = vadd.f32 %v1278_v63, %v736_v38  ;;  %705 = vst.msk [vmem:[#allocation2 + $0xb0] sm:$0xff] %vm223_vm1, %v672_v35  ;;  %v723_v47 = vld [vmem:[#allocation2 + $0x28] sm:$0xff]  ;;  %v531_v49 = vpop.f32.mrf.mxu0  ;;  %v611_v50 = vpop.f32.mrf.mxu1  ;;  %v270_v33 = vld [vmem:[#allocation2 + $0x70] sm:$0xff] }
  0xe9   : > { %v739_v48 = vld [vmem:[#allocation2 + $0xa8] sm:$0xff]  ;;  %791 = vst.msk [vmem:[%s1287_s7 + $0x10] sm:$0xff] %vm223_vm1, %v759_v42  ;;  %v762_v52 = vadd.f32 %v1278_v63, %v723_v47  ;;  %692 = vst.msk [vmem:[#allocation2 + $0x48] sm:$0xff] %vm223_vm1, %v659_v44  ;;  %v658_v54 = vadd.f32 %v531_v49, %v264_v36  ;;  %v674_v55 = vadd.f32 %v611_v50, %v280_v41  ;;  %v286_v38 = vld [vmem:[#allocation2 + $0xf0] sm:$0xff] }
  0xea   : > { %807 = vst.msk [vmem:[%s1287_s7 + $0x90] sm:$0xff] %vm223_vm1, %v775_v43  ;;  %v778_v53 = vadd.f32 %v1278_v63, %v739_v48  ;;  %708 = vst.msk [vmem:[#allocation2 + $0xc8] sm:$0xff] %vm223_vm1, %v675_v45  ;;  %v722_v57 = vld [vmem:[#allocation2 + $0x20] sm:$0xff]  ;;  %v1011_v59 = vpop.f32.mrf.mxu0  ;;  %v1035_v60 = vpop.f32.mrf.mxu1 }
  0xeb   : > { %v738_v58 = vld [vmem:[#allocation2 + $0xa0] sm:$0xff]  ;;  %794 = vst.msk [vmem:[%s1287_s7 + $0x28] sm:$0xff] %vm223_vm1, %v762_v52  ;;  %v761_v62 = vadd.f32 %v1278_v63, %v722_v57  ;;  %691 = vst.msk [vmem:[#allocation2 + $0x40] sm:$0xff] %vm223_vm1, %v658_v54  ;;  %v661_v1 = vadd.f32 %v1011_v59, %v267_v46  ;;  %v677_v2 = vadd.f32 %v1035_v60, %v283_v51 }
  0xec   : > { %810 = vst.msk [vmem:[%s1287_s7 + $0xa8] sm:$0xff] %vm223_vm1, %v778_v53  ;;  %v777_v0 = vadd.f32 %v1278_v63, %v738_v58  ;;  %707 = vst.msk [vmem:[#allocation2 + $0xc0] sm:$0xff] %vm223_vm1, %v674_v55  ;;  %v725_v4 = vld [vmem:[#allocation2 + $0x38] sm:$0xff]  ;;  %v541_v6 = vpop.f32.mrf.mxu0  ;;  %v621_v7 = vpop.f32.mrf.mxu1 }
  0xed   : > { %v741_v5 = vld [vmem:[#allocation2 + $0xb8] sm:$0xff]  ;;  %793 = vst.msk [vmem:[%s1287_s7 + $0x20] sm:$0xff] %vm223_vm1, %v761_v62  ;;  %v764_v9 = vadd.f32 %v1278_v63, %v725_v4  ;;  %694 = vst.msk [vmem:[#allocation2 + $0x58] sm:$0xff] %vm223_vm1, %v661_v1  ;;  %v660_v11 = vadd.f32 %v541_v6, %v266_v56  ;;  %v676_v12 = vadd.f32 %v621_v7, %v282_v61 }
  0xee   : > { %809 = vst.msk [vmem:[%s1287_s7 + $0xa0] sm:$0xff] %vm223_vm1, %v777_v0  ;;  %v780_v10 = vadd.f32 %v1278_v63, %v741_v5  ;;  %710 = vst.msk [vmem:[#allocation2 + $0xd8] sm:$0xff] %vm223_vm1, %v677_v2  ;;  %v724_v14 = vld [vmem:[#allocation2 + $0x30] sm:$0xff]  ;;  %v1014_v16 = vpop.f32.mrf.mxu0  ;;  %v1038_v17 = vpop.f32.mrf.mxu1 }
  0xef   : > { %v740_v15 = vld [vmem:[#allocation2 + $0xb0] sm:$0xff]  ;;  %796 = vst.msk [vmem:[%s1287_s7 + $0x38] sm:$0xff] %vm223_vm1, %v764_v9  ;;  %v763_v19 = vadd.f32 %v1278_v63, %v724_v14  ;;  %693 = vst.msk [vmem:[#allocation2 + $0x50] sm:$0xff] %vm223_vm1, %v660_v11  ;;  %v663_v21 = vadd.f32 %v1014_v16, %v269_v3  ;;  %v679_v22 = vadd.f32 %v1038_v17, %v285_v8 }
  0xf0   : > { %812 = vst.msk [vmem:[%s1287_s7 + $0xb8] sm:$0xff] %vm223_vm1, %v780_v10  ;;  %v779_v20 = vadd.f32 %v1278_v63, %v740_v15  ;;  %709 = vst.msk [vmem:[#allocation2 + $0xd0] sm:$0xff] %vm223_vm1, %v676_v12  ;;  %v727_v24 = vld [vmem:[#allocation2 + $0x48] sm:$0xff]  ;;  %v551_v26 = vpop.f32.mrf.mxu0  ;;  %v631_v27 = vpop.f32.mrf.mxu1 }
  0xf1   : > { %v743_v25 = vld [vmem:[#allocation2 + $0xc8] sm:$0xff]  ;;  %795 = vst.msk [vmem:[%s1287_s7 + $0x30] sm:$0xff] %vm223_vm1, %v763_v19  ;;  %v766_v29 = vadd.f32 %v1278_v63, %v727_v24  ;;  %696 = vst.msk [vmem:[#allocation2 + $0x68] sm:$0xff] %vm223_vm1, %v663_v21  ;;  %v662_v31 = vadd.f32 %v551_v26, %v268_v13  ;;  %v678_v32 = vadd.f32 %v631_v27, %v284_v18 }
  0xf2   : > { %811 = vst.msk [vmem:[%s1287_s7 + $0xb0] sm:$0xff] %vm223_vm1, %v779_v20  ;;  %v782_v30 = vadd.f32 %v1278_v63, %v743_v25  ;;  %712 = vst.msk [vmem:[#allocation2 + $0xe8] sm:$0xff] %vm223_vm1, %v679_v22  ;;  %v726_v34 = vld [vmem:[#allocation2 + $0x40] sm:$0xff]  ;;  %v1017_v36 = vpop.f32.mrf.mxu0  ;;  %v1041_v37 = vpop.f32.mrf.mxu1 }
  0xf3   : > { %v742_v35 = vld [vmem:[#allocation2 + $0xc0] sm:$0xff]  ;;  %798 = vst.msk [vmem:[%s1287_s7 + $0x48] sm:$0xff] %vm223_vm1, %v766_v29  ;;  %v765_v39 = vadd.f32 %v1278_v63, %v726_v34  ;;  %695 = vst.msk [vmem:[#allocation2 + $0x60] sm:$0xff] %vm223_vm1, %v662_v31  ;;  %v665_v41 = vadd.f32 %v1017_v36, %v271_v23  ;;  %v681_v42 = vadd.f32 %v1041_v37, %v287_v28 }
  0xf4   : > { %814 = vst.msk [vmem:[%s1287_s7 + $0xc8] sm:$0xff] %vm223_vm1, %v782_v30  ;;  %v781_v40 = vadd.f32 %v1278_v63, %v742_v35  ;;  %711 = vst.msk [vmem:[#allocation2 + $0xe0] sm:$0xff] %vm223_vm1, %v678_v32  ;;  %v729_v43 = vld [vmem:[#allocation2 + $0x58] sm:$0xff]  ;;  %v561_v45 = vpop.f32.mrf.mxu0  ;;  %v641_v46 = vpop.f32.mrf.mxu1 }
  0xf5   : > { %v745_v44 = vld [vmem:[#allocation2 + $0xd8] sm:$0xff]  ;;  %797 = vst.msk [vmem:[%s1287_s7 + $0x40] sm:$0xff] %vm223_vm1, %v765_v39  ;;  %v768_v47 = vadd.f32 %v1278_v63, %v729_v43  ;;  %698 = vst.msk [vmem:[#allocation2 + $0x78] sm:$0xff] %vm223_vm1, %v665_v41  ;;  %v664_v49 = vadd.f32 %v561_v45, %v270_v33  ;;  %v680_v50 = vadd.f32 %v641_v46, %v286_v38 }
  0xf6   : > { %813 = vst.msk [vmem:[%s1287_s7 + $0xc0] sm:$0xff] %vm223_vm1, %v781_v40  ;;  %v784_v48 = vadd.f32 %v1278_v63, %v745_v44  ;;  %714 = vst.msk [vmem:[#allocation2 + $0xf8] sm:$0xff] %vm223_vm1, %v681_v42  ;;  %v728_v51 = vld [vmem:[#allocation2 + $0x50] sm:$0xff] }
  0xf7   : > { %v744_v52 = vld [vmem:[#allocation2 + $0xd0] sm:$0xff]  ;;  %800 = vst.msk [vmem:[%s1287_s7 + $0x58] sm:$0xff] %vm223_vm1, %v768_v47  ;;  %v767_v53 = vadd.f32 %v1278_v63, %v728_v51  ;;  %697 = vst.msk [vmem:[#allocation2 + $0x70] sm:$0xff] %vm223_vm1, %v664_v49 }
  0xf8   : > { %816 = vst.msk [vmem:[%s1287_s7 + $0xd8] sm:$0xff] %vm223_vm1, %v784_v48  ;;  %v783_v54 = vadd.f32 %v1278_v63, %v744_v52  ;;  %713 = vst.msk [vmem:[#allocation2 + $0xf0] sm:$0xff] %vm223_vm1, %v680_v50  ;;  %v731_v55 = vld [vmem:[#allocation2 + $0x68] sm:$0xff] }
  0xf9   : > { %v747_v56 = vld [vmem:[#allocation2 + $0xe8] sm:$0xff]  ;;  %799 = vst.msk [vmem:[%s1287_s7 + $0x50] sm:$0xff] %vm223_vm1, %v767_v53  ;;  %v770_v57 = vadd.f32 %v1278_v63, %v731_v55 }
  0xfa   : > { %815 = vst.msk [vmem:[%s1287_s7 + $0xd0] sm:$0xff] %vm223_vm1, %v783_v54  ;;  %v786_v58 = vadd.f32 %v1278_v63, %v747_v56  ;;  %v730_v59 = vld [vmem:[#allocation2 + $0x60] sm:$0xff] }
  0xfb   : > { %v746_v60 = vld [vmem:[#allocation2 + $0xe0] sm:$0xff]  ;;  %802 = vst.msk [vmem:[%s1287_s7 + $0x68] sm:$0xff] %vm223_vm1, %v770_v57  ;;  %v769_v61 = vadd.f32 %v1278_v63, %v730_v59 }
  0xfc   : > { %818 = vst.msk [vmem:[%s1287_s7 + $0xe8] sm:$0xff] %vm223_vm1, %v786_v58  ;;  %v785_v62 = vadd.f32 %v1278_v63, %v746_v60  ;;  %v733_v0 = vld [vmem:[#allocation2 + $0x78] sm:$0xff] }
  0xfd   : > { %v749_v1 = vld [vmem:[#allocation2 + $0xf8] sm:$0xff]  ;;  %801 = vst.msk [vmem:[%s1287_s7 + $0x60] sm:$0xff] %vm223_vm1, %v769_v61  ;;  %v772_v2 = vadd.f32 %v1278_v63, %v733_v0 }
  0xfe   : > { %817 = vst.msk [vmem:[%s1287_s7 + $0xe0] sm:$0xff] %vm223_vm1, %v785_v62  ;;  %v788_v3 = vadd.f32 %v1278_v63, %v749_v1  ;;  %v732_v4 = vld [vmem:[#allocation2 + $0x70] sm:$0xff] }
  0xff   : > { %v748_v5 = vld [vmem:[#allocation2 + $0xf0] sm:$0xff]  ;;  %804 = vst.msk [vmem:[%s1287_s7 + $0x78] sm:$0xff] %vm223_vm1, %v772_v2  ;;  %v771_v6 = vadd.f32 %v1278_v63, %v732_v4 }
 0x100   : > { %820 = vst.msk [vmem:[%s1287_s7 + $0xf8] sm:$0xff] %vm223_vm1, %v788_v3  ;;  %v787_v7 = vadd.f32 %v1278_v63, %v748_v5 }
 0x101   : > { %803 = vst.msk [vmem:[%s1287_s7 + $0x70] sm:$0xff] %vm223_vm1, %v771_v6 }
 0x102   : > { %819 = vst.msk [vmem:[%s1287_s7 + $0xf0] sm:$0xff] %vm223_vm1, %v787_v7 }
 0x103 PF: > { %s13_s14 = sadd.s32 1, %s1097_s14   ;;  %s1423_s12 = smov %s1093_s13 }
 0x104   : > { %p10_p5 = scmp.ge.s32.totalorder %s13_s14, 4   ;;  %s1424_s13 = smov %s1426_s15 }
 0x106   :  { %12 = sbr.rel (!%p10_p5) target bundleno = 2 (0x2), region = 73 }

// kernel: feature_extractor.8
= control target key start
LH: loop header
LB: loop body
LE: loop exit
PB: predicated region body
PF: predicated region fallthrough
CT: control target
= control target key end

     0   :  { %s948_s12 = smov 0   ;;  %s950_s13 = smov 0   ;;  %s1250_s0 = inlined_call_operand.vmem [shape: f32[128,768], index: 0, kind: input, shape index: {}]   ;;  %s1251_s1 = inlined_call_operand.vmem [shape: f32[768,64], index: 1, kind: input, shape index: {}]   ;;  %s1252_s2 = inlined_call_operand.vmem [shape: f32[1,64], index: 2, kind: input, shape index: {}]   ;;  %s1253_s3 = inlined_call_operand.vmem [shape: f32[128,64], index: 3, kind: output, shape index: {}]  }
   0x1   :  { %s952_s14 = smov 0   ;;  %s954_s15 = smov 0  }
   0x2   :  { %s956_s16 = smov 0  }
   0x3 LB: > { %s22_s17 = sadd.s32 1, %s921_s15  ;;  %p41_p1 = scmp.ne.s32.totalorder %s913_s13, %s909_s12  ;;  %s925_s16 = sphi %s956_s16, %s13_s16   ;;  %s921_s15 = sphi %s954_s15, %s1257_s15   ;;  %s917_s14 = sphi %s952_s14, %s1256_s14   ;;  %s913_s13 = sphi %s950_s13, %s1255_s13   ;;  %s909_s12 = sphi %s948_s12, %s1254_s12  }
   0x4   : > { %p23_p0 = scmp.ge.s32.totalorder %s22_s17, 3  ;;  %p42_p2 = scmp.eq.s32.totalorder %s925_s16, 0 }
   0x5   : > { %s34_s19 = sadd.s32 1, %s913_s13  ;;  %p718_p5 = scmp.ge.s32.totalorder %s925_s16, 3 }
   0x6   : > { %s1259_s17 = smov (%p23_p0, %s22_s17), 0  ;;  %p43_p3 = por %p42_p2, %p41_p1 }
   0x7   : > { %s30_s18 = ssub.s32 %s921_s15, %s1259_s17  ;;  %143 = sbr.rel (%p718_p5) target bundleno = 32 (0x20), region = 20 }
   0x8   : > { %p32_p4 = scmp.eq.s32.totalorder %s30_s18, 0 }
   0xa   : > { %s983_s20 = scalar_select %p32_p4, %s913_s13, %s34_s19  }
   0xc   : > { %146 = sbr.rel (!%p43_p3) target bundleno = 32 (0x20), region = 24  ;;  %s148_s21 = sand.u32 (%p43_p3), 1, %s913_s13  }
   0xd   : > { %s733_s22 = sshll.u32 (%p43_p3), %s921_s15, 4  ;;  %s719_s23 = sshll.u32 (%p43_p3), %s148_s21, 8 }
   0xe   : > { %s991_s26 = scalar_lea.vmem (%p43_p3), %s1250_s0, %s733_s22  ;;  %s996_s27 = scalar_lea.vmem (%p43_p3), [#allocation3], %s719_s23 }
   0xf   : > { %v169_v0 = vld [vmem:[%s991_s26] sm:$0xff] (%p43_p3)  ;;  %v171_v1 = vld [vmem:[%s991_s26 + $0x8] sm:$0xff] (%p43_p3)  ;;  %v173_v2 = vld [vmem:[%s991_s26 + $0x30] sm:$0xff] (%p43_p3) }
  0x10   : > { %170 = vst [vmem:[%s996_s27] sm:$0xff] (%p43_p3), %v169_v0  ;;  %172 = vst [vmem:[%s996_s27 + $0x8] sm:$0xff] (%p43_p3), %v171_v1  ;;  %v175_v3 = vld [vmem:[%s991_s26 + $0x38] sm:$0xff] (%p43_p3)  ;;  %v177_v4 = vld [vmem:[%s991_s26 + $0x60] sm:$0xff] (%p43_p3) }
  0x11   : > { %174 = vst [vmem:[%s996_s27 + $0x10] sm:$0xff] %v173_v2  ;;  %v179_v5 = vld [vmem:[%s991_s26 + $0x68] sm:$0xff]  ;;  %176 = vst [vmem:[%s996_s27 + $0x18] sm:$0xff] %v175_v3  ;;  %v181_v6 = vld [vmem:[%s991_s26 + $0x90] sm:$0xff] }
  0x12   : > { %178 = vst [vmem:[%s996_s27 + $0x20] sm:$0xff] %v177_v4  ;;  %180 = vst [vmem:[%s996_s27 + $0x28] sm:$0xff] %v179_v5  ;;  %v183_v7 = vld [vmem:[%s991_s26 + $0x98] sm:$0xff]  ;;  %v185_v8 = vld [vmem:[%s991_s26 + $0xc0] sm:$0xff] }
  0x13   : > { %182 = vst [vmem:[%s996_s27 + $0x30] sm:$0xff] %v181_v6  ;;  %184 = vst [vmem:[%s996_s27 + $0x38] sm:$0xff] %v183_v7  ;;  %v187_v9 = vld [vmem:[%s991_s26 + $0xc8] sm:$0xff]  ;;  %v189_v10 = vld [vmem:[%s991_s26 + $0xf0] sm:$0xff] }
  0x14   : > { %186 = vst [vmem:[%s996_s27 + $0x40] sm:$0xff] %v185_v8  ;;  %v191_v11 = vld [vmem:[%s991_s26 + $0xf8] sm:$0xff]  ;;  %188 = vst [vmem:[%s996_s27 + $0x48] sm:$0xff] %v187_v9  ;;  %v193_v12 = vld [vmem:[%s991_s26 + $0x120] sm:$0xff] }
  0x15   : > { %190 = vst [vmem:[%s996_s27 + $0x50] sm:$0xff] %v189_v10  ;;  %192 = vst [vmem:[%s996_s27 + $0x58] sm:$0xff] %v191_v11  ;;  %v195_v13 = vld [vmem:[%s991_s26 + $0x128] sm:$0xff]  ;;  %v197_v14 = vld [vmem:[%s991_s26 + $0x150] sm:$0xff] }
  0x16   : > { %194 = vst [vmem:[%s996_s27 + $0x60] sm:$0xff] %v193_v12  ;;  %196 = vst [vmem:[%s996_s27 + $0x68] sm:$0xff] %v195_v13  ;;  %v199_v15 = vld [vmem:[%s991_s26 + $0x158] sm:$0xff]  ;;  %v201_v16 = vld [vmem:[%s991_s26 + $0x180] sm:$0xff] }
  0x17   : > { %198 = vst [vmem:[%s996_s27 + $0x70] sm:$0xff] %v197_v14  ;;  %v203_v17 = vld [vmem:[%s991_s26 + $0x188] sm:$0xff]  ;;  %200 = vst [vmem:[%s996_s27 + $0x78] sm:$0xff] %v199_v15  ;;  %v205_v18 = vld [vmem:[%s991_s26 + $0x1b0] sm:$0xff] }
  0x18   : > { %202 = vst [vmem:[%s996_s27 + $0x80] sm:$0xff] %v201_v16  ;;  %204 = vst [vmem:[%s996_s27 + $0x88] sm:$0xff] %v203_v17  ;;  %v207_v19 = vld [vmem:[%s991_s26 + $0x1b8] sm:$0xff]  ;;  %v209_v20 = vld [vmem:[%s991_s26 + $0x1e0] sm:$0xff] }
  0x19   : > { %206 = vst [vmem:[%s996_s27 + $0x90] sm:$0xff] %v205_v18  ;;  %208 = vst [vmem:[%s996_s27 + $0x98] sm:$0xff] %v207_v19  ;;  %v211_v21 = vld [vmem:[%s991_s26 + $0x1e8] sm:$0xff]  ;;  %v213_v22 = vld [vmem:[%s991_s26 + $0x210] sm:$0xff] }
  0x1a   : > { %210 = vst [vmem:[%s996_s27 + $0xa0] sm:$0xff] %v209_v20  ;;  %v215_v23 = vld [vmem:[%s991_s26 + $0x218] sm:$0xff]  ;;  %212 = vst [vmem:[%s996_s27 + $0xa8] sm:$0xff] %v211_v21  ;;  %v217_v24 = vld [vmem:[%s991_s26 + $0x240] sm:$0xff] }
  0x1b   : > { %214 = vst [vmem:[%s996_s27 + $0xb0] sm:$0xff] %v213_v22  ;;  %216 = vst [vmem:[%s996_s27 + $0xb8] sm:$0xff] %v215_v23  ;;  %v219_v25 = vld [vmem:[%s991_s26 + $0x248] sm:$0xff]  ;;  %v221_v26 = vld [vmem:[%s991_s26 + $0x270] sm:$0xff] }
  0x1c   : > { %218 = vst [vmem:[%s996_s27 + $0xc0] sm:$0xff] %v217_v24  ;;  %220 = vst [vmem:[%s996_s27 + $0xc8] sm:$0xff] %v219_v25  ;;  %v223_v27 = vld [vmem:[%s991_s26 + $0x278] sm:$0xff]  ;;  %v225_v28 = vld [vmem:[%s991_s26 + $0x2a0] sm:$0xff] }
  0x1d   : > { %222 = vst [vmem:[%s996_s27 + $0xd0] sm:$0xff] %v221_v26  ;;  %v227_v29 = vld [vmem:[%s991_s26 + $0x2a8] sm:$0xff]  ;;  %224 = vst [vmem:[%s996_s27 + $0xd8] sm:$0xff] %v223_v27  ;;  %v229_v30 = vld [vmem:[%s991_s26 + $0x2d0] sm:$0xff] }
  0x1e   : > { %226 = vst [vmem:[%s996_s27 + $0xe0] sm:$0xff] %v225_v28  ;;  %228 = vst [vmem:[%s996_s27 + $0xe8] sm:$0xff] %v227_v29  ;;  %v231_v31 = vld [vmem:[%s991_s26 + $0x2d8] sm:$0xff] }
  0x1f   : > { %230 = vst [vmem:[%s996_s27 + $0xf0] sm:$0xff] %v229_v30  ;;  %232 = vst [vmem:[%s996_s27 + $0xf8] sm:$0xff] %v231_v31 }
  0x20 PF: > { %p722_p6 = scmp.ge.s32.totalorder %s925_s16, 1  ;;  %p246_p7 = scmp.lt.s32.totalorder %s925_s16, 4 }
  0x22   : > { %p247_p8 = pnand %p722_p6, %p246_p7 }
  0x23   : > { %s253_s28 = sand.u32 (!%p247_p8), 1, %s909_s12   ;;  %s724_s29 = sshll.u32 (!%p247_p8), %s917_s14, 5 }
  0x24   : > { %250 = sbr.rel (%p247_p8) target bundleno = 329 (0x149), region = 51  ;;  %s723_s30 = sshll.u32 (!%p247_p8), %s253_s28, 8 }
  0x25   : > { %p284_p9 = scmp.lt.s32.totalorder (!%p247_p8), %s724_s29, 95  ;;  %s1068_s8 = scalar_lea.vmem (!%p247_p8), [#allocation3], %s723_s30 }
  0x26   : > { %p726_p10 = scmp.ne.s32.totalorder (!%p247_p8), %s917_s14, 0 }
  0x29   : > { %s1261_s29 = smov (!%p284_p9, %s724_s29), 95  ;;  %298 = sbr.rel (%p726_p10) target bundleno = 55 (0x37), region = 59 }
  0x2a   : > { %s725_s4 = sshll.u32 %s1261_s29, 3 }
  0x2b   : > { %s1066_s7 = scalar_lea.vmem %s1251_s1, %s725_s4 }
  0x2e   : > { %vm299_vm0 = vcmask 523264   ;;  %v927_v32 = vmov 0.0  }
  0x2f   : > { %300 = vst.msk [vmem:[#allocation2] sm:$0xff] %vm299_vm0, %v927_v32  ;;  %301 = vst.msk [vmem:[#allocation2 + $0x8] sm:$0xff] %vm299_vm0, %v927_v32 }
  0x30   : > { %302 = vst.msk [vmem:[#allocation2 + $0x10] sm:$0xff] %vm299_vm0, %v927_v32  ;;  %303 = vst.msk [vmem:[#allocation2 + $0x18] sm:$0xff] %vm299_vm0, %v927_v32 }
  0x31   : > { %304 = vst.msk [vmem:[#allocation2 + $0x20] sm:$0xff] %vm299_vm0, %v927_v32  ;;  %305 = vst.msk [vmem:[#allocation2 + $0x28] sm:$0xff] %vm299_vm0, %v927_v32 }
  0x32   : > { %306 = vst.msk [vmem:[#allocation2 + $0x30] sm:$0xff] %vm299_vm0, %v927_v32  ;;  %307 = vst.msk [vmem:[#allocation2 + $0x38] sm:$0xff] %vm299_vm0, %v927_v32 }
  0x33   : > { %308 = vst.msk [vmem:[#allocation2 + $0x40] sm:$0xff] %vm299_vm0, %v927_v32  ;;  %309 = vst.msk [vmem:[#allocation2 + $0x48] sm:$0xff] %vm299_vm0, %v927_v32 }
  0x34   : > { %310 = vst.msk [vmem:[#allocation2 + $0x50] sm:$0xff] %vm299_vm0, %v927_v32  ;;  %311 = vst.msk [vmem:[#allocation2 + $0x58] sm:$0xff] %vm299_vm0, %v927_v32 }
  0x35   : > { %312 = vst.msk [vmem:[#allocation2 + $0x60] sm:$0xff] %vm299_vm0, %v927_v32  ;;  %313 = vst.msk [vmem:[#allocation2 + $0x68] sm:$0xff] %vm299_vm0, %v927_v32 }
  0x36   : > { %314 = vst.msk [vmem:[#allocation2 + $0x70] sm:$0xff] %vm299_vm0, %v927_v32  ;;  %315 = vst.msk [vmem:[#allocation2 + $0x78] sm:$0xff] %vm299_vm0, %v927_v32 }
  0x37 PF: > { %v395_v33 = vld [vmem:[%s1066_s7 + $0xf8] sm:$0xff]  ;;  %v394_v35 = vld [vmem:[%s1066_s7 + $0xf0] sm:$0xff]  ;;  %v393_v37 = vld [vmem:[%s1066_s7 + $0xe8] sm:$0xff]  ;;  %vm557_vm1 = vcmask 523264   ;;  %p727_p11 = scmp.ne.s32.totalorder %s917_s14, 2 }
  0x38   : > { %v379_v34 = vld [vmem:[%s1066_s7 + $0x78] sm:$0xff]  ;;  %734 = vmatprep.subr.mxu0 %v395_v33  ;;  %814 = vmatprep.subr.mxu1 %v395_v33  ;;  %v378_v36 = vld [vmem:[%s1066_s7 + $0x70] sm:$0xff]  ;;  %v377_v38 = vld [vmem:[%s1066_s7 + $0x68] sm:$0xff] }
  0x39   : > { %735 = vmatpush3.msra.mxu0 %v379_v34  ;;  %830 = vmatpush3.msra.mxu1 %v379_v34  ;;  %v392_v39 = vld [vmem:[%s1066_s7 + $0xe0] sm:$0xff]  ;;  %v391_v41 = vld [vmem:[%s1066_s7 + $0xd8] sm:$0xff]  ;;  %v390_v43 = vld [vmem:[%s1066_s7 + $0xd0] sm:$0xff] }
  0x3a   : > { %736 = vmatprep.subr.mxu0 %v394_v35  ;;  %815 = vmatprep.subr.mxu1 %v394_v35  ;;  %v376_v40 = vld [vmem:[%s1066_s7 + $0x60] sm:$0xff]  ;;  %v375_v42 = vld [vmem:[%s1066_s7 + $0x58] sm:$0xff]  ;;  %v374_v44 = vld [vmem:[%s1066_s7 + $0x50] sm:$0xff] }
  0x3b   : > { %737 = vmatpush3.msra.mxu0 %v378_v36  ;;  %831 = vmatpush3.msra.mxu1 %v378_v36  ;;  %v389_v45 = vld [vmem:[%s1066_s7 + $0xc8] sm:$0xff]  ;;  %v388_v47 = vld [vmem:[%s1066_s7 + $0xc0] sm:$0xff]  ;;  %v387_v49 = vld [vmem:[%s1066_s7 + $0xb8] sm:$0xff] }
  0x3c   : > { %738 = vmatprep.subr.mxu0 %v393_v37  ;;  %816 = vmatprep.subr.mxu1 %v393_v37  ;;  %v373_v46 = vld [vmem:[%s1066_s7 + $0x48] sm:$0xff]  ;;  %v372_v48 = vld [vmem:[%s1066_s7 + $0x40] sm:$0xff]  ;;  %v371_v50 = vld [vmem:[%s1066_s7 + $0x38] sm:$0xff] }
  0x3d   : > { %739 = vmatpush3.msra.mxu0 %v377_v38  ;;  %832 = vmatpush3.msra.mxu1 %v377_v38  ;;  %v386_v51 = vld [vmem:[%s1066_s7 + $0xb0] sm:$0xff]  ;;  %v385_v53 = vld [vmem:[%s1066_s7 + $0xa8] sm:$0xff]  ;;  %v384_v55 = vld [vmem:[%s1066_s7 + $0xa0] sm:$0xff] }
  0x3e   : > { %740 = vmatprep.subr.mxu0 %v392_v39  ;;  %817 = vmatprep.subr.mxu1 %v392_v39  ;;  %v370_v52 = vld [vmem:[%s1066_s7 + $0x30] sm:$0xff]  ;;  %v369_v54 = vld [vmem:[%s1066_s7 + $0x28] sm:$0xff]  ;;  %v368_v56 = vld [vmem:[%s1066_s7 + $0x20] sm:$0xff] }
  0x3f   : > { %741 = vmatpush3.msra.mxu0 %v376_v40  ;;  %833 = vmatpush3.msra.mxu1 %v376_v40  ;;  %v383_v57 = vld [vmem:[%s1066_s7 + $0x98] sm:$0xff]  ;;  %v382_v59 = vld [vmem:[%s1066_s7 + $0x90] sm:$0xff]  ;;  %v381_v61 = vld [vmem:[%s1066_s7 + $0x88] sm:$0xff] }
  0x40   : > { %742 = vmatprep.subr.mxu0 %v391_v41  ;;  %818 = vmatprep.subr.mxu1 %v391_v41  ;;  %v367_v58 = vld [vmem:[%s1066_s7 + $0x18] sm:$0xff]  ;;  %v366_v60 = vld [vmem:[%s1066_s7 + $0x10] sm:$0xff]  ;;  %v365_v62 = vld [vmem:[%s1066_s7 + $0x8] sm:$0xff] }
  0x41   : > { %743 = vmatpush3.msra.mxu0 %v375_v42  ;;  %834 = vmatpush3.msra.mxu1 %v375_v42  ;;  %v380_v63 = vld [vmem:[%s1066_s7 + $0x80] sm:$0xff]  ;;  %v333_v1 = vld [vmem:[%s1068_s8 + $0x8] sm:$0xff]  ;;  %v335_v5 = vld [vmem:[%s1068_s8 + $0x18] sm:$0xff] }
  0x42   : > { %744 = vmatprep.subr.mxu0 %v390_v43  ;;  %819 = vmatprep.subr.mxu1 %v390_v43  ;;  %v364_v0 = vld [vmem:[%s1066_s7] sm:$0xff]  ;;  %v349_v2 = vld [vmem:[%s1068_s8 + $0x88] sm:$0xff]  ;;  %v351_v6 = vld [vmem:[%s1068_s8 + $0x98] sm:$0xff] }
  0x43   : > { %745 = vmatpush3.msra.mxu0 %v374_v44  ;;  %835 = vmatpush3.msra.mxu1 %v374_v44  ;;  %v332_v3 = vld [vmem:[%s1068_s8] sm:$0xff]  ;;  %v334_v7 = vld [vmem:[%s1068_s8 + $0x10] sm:$0xff]  ;;  %v337_v9 = vld [vmem:[%s1068_s8 + $0x28] sm:$0xff] }
  0x44   : > { %746 = vmatprep.subr.mxu0 %v389_v45  ;;  %820 = vmatprep.subr.mxu1 %v389_v45  ;;  %v348_v4 = vld [vmem:[%s1068_s8 + $0x80] sm:$0xff]  ;;  %v350_v8 = vld [vmem:[%s1068_s8 + $0x90] sm:$0xff]  ;;  %v353_v10 = vld [vmem:[%s1068_s8 + $0xa8] sm:$0xff] }
  0x45   : > { %747 = vmatpush3.msra.mxu0 %v373_v46  ;;  %836 = vmatpush3.msra.mxu1 %v373_v46  ;;  %v336_v11 = vld [vmem:[%s1068_s8 + $0x20] sm:$0xff]  ;;  %v339_v13 = vld [vmem:[%s1068_s8 + $0x38] sm:$0xff]  ;;  %v338_v15 = vld [vmem:[%s1068_s8 + $0x30] sm:$0xff] }
  0x46   : > { %748 = vmatprep.subr.mxu0 %v388_v47  ;;  %821 = vmatprep.subr.mxu1 %v388_v47  ;;  %v352_v12 = vld [vmem:[%s1068_s8 + $0xa0] sm:$0xff]  ;;  %v355_v14 = vld [vmem:[%s1068_s8 + $0xb8] sm:$0xff]  ;;  %v354_v16 = vld [vmem:[%s1068_s8 + $0xb0] sm:$0xff] }
  0x47   : > { %749 = vmatpush3.msra.mxu0 %v372_v48  ;;  %837 = vmatpush3.msra.mxu1 %v372_v48  ;;  %v341_v17 = vld [vmem:[%s1068_s8 + $0x48] sm:$0xff]  ;;  %v340_v19 = vld [vmem:[%s1068_s8 + $0x40] sm:$0xff]  ;;  %v343_v21 = vld [vmem:[%s1068_s8 + $0x58] sm:$0xff] }
  0x48   : > { %750 = vmatprep.subr.mxu0 %v387_v49  ;;  %822 = vmatprep.subr.mxu1 %v387_v49  ;;  %v357_v18 = vld [vmem:[%s1068_s8 + $0xc8] sm:$0xff]  ;;  %v356_v20 = vld [vmem:[%s1068_s8 + $0xc0] sm:$0xff]  ;;  %v359_v22 = vld [vmem:[%s1068_s8 + $0xd8] sm:$0xff] }
  0x49   : > { %751 = vmatpush3.msra.mxu0 %v371_v50  ;;  %838 = vmatpush3.msra.mxu1 %v371_v50  ;;  %v342_v23 = vld [vmem:[%s1068_s8 + $0x50] sm:$0xff]  ;;  %v345_v25 = vld [vmem:[%s1068_s8 + $0x68] sm:$0xff]  ;;  %v344_v27 = vld [vmem:[%s1068_s8 + $0x60] sm:$0xff] }
  0x4a   : > { %752 = vmatprep.subr.mxu0 %v386_v51  ;;  %823 = vmatprep.subr.mxu1 %v386_v51  ;;  %v358_v24 = vld [vmem:[%s1068_s8 + $0xd0] sm:$0xff]  ;;  %v361_v26 = vld [vmem:[%s1068_s8 + $0xe8] sm:$0xff]  ;;  %v360_v28 = vld [vmem:[%s1068_s8 + $0xe0] sm:$0xff] }
  0x4b   : > { %753 = vmatpush3.msra.mxu0 %v370_v52  ;;  %839 = vmatpush3.msra.mxu1 %v370_v52  ;;  %v347_v29 = vld [vmem:[%s1068_s8 + $0x78] sm:$0xff]  ;;  %v346_v31 = vld [vmem:[%s1068_s8 + $0x70] sm:$0xff]  ;;  %v316_v35 = vld [vmem:[#allocation2] sm:$0xff] }
  0x4c   : > { %754 = vmatprep.subr.mxu0 %v385_v53  ;;  %824 = vmatprep.subr.mxu1 %v385_v53  ;;  %v363_v30 = vld [vmem:[%s1068_s8 + $0xf8] sm:$0xff]  ;;  %v362_v32 = vld [vmem:[%s1068_s8 + $0xf0] sm:$0xff]  ;;  %v324_v37 = vld [vmem:[#allocation2 + $0x40] sm:$0xff] }
  0x4d   : > { %755 = vmatpush3.msra.mxu0 %v369_v54  ;;  %840 = vmatpush3.msra.mxu1 %v369_v54  ;;  %v317_v45 = vld [vmem:[#allocation2 + $0x8] sm:$0xff] }
  0x4e   : > { %756 = vmatprep.subr.mxu0 %v384_v55  ;;  %825 = vmatprep.subr.mxu1 %v384_v55  ;;  %v325_v47 = vld [vmem:[#allocation2 + $0x48] sm:$0xff]  ;;  %v318_v55 = vld [vmem:[#allocation2 + $0x10] sm:$0xff] }
  0x4f   : > { %757 = vmatpush3.msra.mxu0 %v368_v56  ;;  %841 = vmatpush3.msra.mxu1 %v368_v56 }
  0x50   : > { %758 = vmatprep.subr.mxu0 %v383_v57  ;;  %826 = vmatprep.subr.mxu1 %v383_v57  ;;  %v326_v57 = vld [vmem:[#allocation2 + $0x50] sm:$0xff] }
  0x51   : > { %759 = vmatpush3.msra.mxu0 %v367_v58  ;;  %842 = vmatpush3.msra.mxu1 %v367_v58 }
  0x52   : > { %760 = vmatprep.subr.mxu0 %v382_v59  ;;  %827 = vmatprep.subr.mxu1 %v382_v59 }
  0x53   : > { %761 = vmatpush3.msra.mxu0 %v366_v60  ;;  %843 = vmatpush3.msra.mxu1 %v366_v60 }
  0x54   : > { %762 = vmatprep.subr.mxu0 %v381_v61  ;;  %828 = vmatprep.subr.mxu1 %v381_v61 }
  0x55   : > { %763 = vmatpush3.msra.mxu0 %v365_v62  ;;  %844 = vmatpush3.msra.mxu1 %v365_v62 }
  0x56   : > { %764 = vmatprep.subr.mxu0 %v380_v63  ;;  %829 = vmatprep.subr.mxu1 %v380_v63 }
  0x57   : > { %765 = vmatpush3.msra.mxu0 %v364_v0  ;;  %845 = vmatpush3.msra.mxu1 %v364_v0 }
  0x58   : > { %460 = vmatprep.mubr.f32.mxu0 %v333_v1  ;;  %500 = vmatprep.mubr.f32.mxu1 %v349_v2  ;;  %v319_v1 = vld [vmem:[#allocation2 + $0x18] sm:$0xff] }
  0x59   : > { %461 = vmatmul.mubr.f32.vlgmr.msra.gmra.mxu0 %v332_v3  ;;  %501 = vmatmul.mubr.f32.vlgmr.msra.gmra.mxu1 %v348_v4  ;;  %v327_v3 = vld [vmem:[#allocation2 + $0x58] sm:$0xff] }
  0x5a   : > { %465 = vmatprep.mubr.f32.mxu0 %v335_v5  ;;  %505 = vmatprep.mubr.f32.mxu1 %v351_v6 }
  0x5d   : > { %466 = vmatmul.mubr.f32.gmra.mxu0 %v334_v7  ;;  %506 = vmatmul.mubr.f32.gmra.mxu1 %v350_v8 }
  0x5e   : > { %470 = vmatprep.mubr.f32.mxu0 %v337_v9  ;;  %510 = vmatprep.mubr.f32.mxu1 %v353_v10 }
  0x61   : > { %471 = vmatmul.mubr.f32.gmra.mxu0 %v336_v11  ;;  %511 = vmatmul.mubr.f32.gmra.mxu1 %v352_v12  ;;  %v320_v11 = vld [vmem:[#allocation2 + $0x20] sm:$0xff] }
  0x62   : > { %475 = vmatprep.mubr.f32.mxu0 %v339_v13  ;;  %515 = vmatprep.mubr.f32.mxu1 %v355_v14  ;;  %v328_v13 = vld [vmem:[#allocation2 + $0x60] sm:$0xff] }
  0x65   : > { %476 = vmatmul.mubr.f32.gmra.mxu0 %v338_v15  ;;  %516 = vmatmul.mubr.f32.gmra.mxu1 %v354_v16 }
  0x66   : > { %480 = vmatprep.mubr.f32.mxu0 %v341_v17  ;;  %520 = vmatprep.mubr.f32.mxu1 %v357_v18 }
  0x69   : > { %481 = vmatmul.mubr.f32.gmra.mxu0 %v340_v19  ;;  %521 = vmatmul.mubr.f32.gmra.mxu1 %v356_v20 }
  0x6a   : > { %485 = vmatprep.mubr.f32.mxu0 %v343_v21  ;;  %525 = vmatprep.mubr.f32.mxu1 %v359_v22  ;;  %v321_v21 = vld [vmem:[#allocation2 + $0x28] sm:$0xff] }
  0x6d   : > { %486 = vmatmul.mubr.f32.gmra.mxu0 %v342_v23  ;;  %526 = vmatmul.mubr.f32.gmra.mxu1 %v358_v24  ;;  %v329_v23 = vld [vmem:[#allocation2 + $0x68] sm:$0xff] }
  0x6e   : > { %490 = vmatprep.mubr.f32.mxu0 %v345_v25  ;;  %530 = vmatprep.mubr.f32.mxu1 %v361_v26 }
  0x71   : > { %491 = vmatmul.mubr.f32.gmra.mxu0 %v344_v27  ;;  %531 = vmatmul.mubr.f32.gmra.mxu1 %v360_v28 }
  0x72   : > { %495 = vmatprep.mubr.f32.mxu0 %v347_v29  ;;  %535 = vmatprep.mubr.f32.mxu1 %v363_v30 }
  0x75   : > { %496 = vmatmul.mubr.f32.gmra.mxu0 %v346_v31  ;;  %536 = vmatmul.mubr.f32.gmra.mxu1 %v362_v32  ;;  %v322_v31 = vld [vmem:[#allocation2 + $0x30] sm:$0xff] }
 0x119   : > { %v766_v33 = vpop.f32.mrf.mxu0  ;;  %v790_v34 = vpop.f32.mrf.mxu1 }
 0x11b   : > { %v767_v36 = vpop.f32.mrf.mxu0  ;;  %v791_v38 = vpop.f32.mrf.mxu1 }
 0x11c   : > { %v768_v39 = vadd.f32 %v767_v36, %v766_v33  ;;  %v792_v40 = vadd.f32 %v791_v38, %v790_v34  ;;  %v330_v33 = vld [vmem:[#allocation2 + $0x70] sm:$0xff] }
 0x11d   : > { %v769_v41 = vpop.f32.mrf.mxu0  ;;  %v793_v42 = vpop.f32.mrf.mxu1 }
 0x11e   : > { %v541_v43 = vadd.f32 %v768_v39, %v316_v35  ;;  %v549_v44 = vadd.f32 %v792_v40, %v324_v37 }
 0x11f   : > { %v770_v46 = vpop.f32.mrf.mxu0  ;;  %v794_v48 = vpop.f32.mrf.mxu1 }
 0x120   : > { %558 = vst.msk [vmem:[#allocation2] sm:$0xff] %vm557_vm1, %v541_v43  ;;  %566 = vst.msk [vmem:[#allocation2 + $0x40] sm:$0xff] %vm557_vm1, %v549_v44  ;;  %v771_v49 = vadd.f32 %v770_v46, %v769_v41  ;;  %v795_v50 = vadd.f32 %v794_v48, %v793_v42  ;;  %v323_v41 = vld [vmem:[#allocation2 + $0x38] sm:$0xff] }
 0x121   : > { %v772_v51 = vpop.f32.mrf.mxu0  ;;  %v796_v52 = vpop.f32.mrf.mxu1  ;;  %v331_v43 = vld [vmem:[#allocation2 + $0x78] sm:$0xff] }
 0x122   : > { %v542_v53 = vadd.f32 %v771_v49, %v317_v45  ;;  %v550_v54 = vadd.f32 %v795_v50, %v325_v47 }
 0x123   : > { %v773_v56 = vpop.f32.mrf.mxu0  ;;  %v797_v58 = vpop.f32.mrf.mxu1 }
 0x124   : > { %559 = vst.msk [vmem:[#allocation2 + $0x8] sm:$0xff] %vm557_vm1, %v542_v53  ;;  %567 = vst.msk [vmem:[#allocation2 + $0x48] sm:$0xff] %vm557_vm1, %v550_v54  ;;  %v774_v59 = vadd.f32 %v773_v56, %v772_v51  ;;  %v798_v60 = vadd.f32 %v797_v58, %v796_v52 }
 0x125   : > { %v775_v61 = vpop.f32.mrf.mxu0  ;;  %v799_v62 = vpop.f32.mrf.mxu1 }
 0x126   : > { %v543_v63 = vadd.f32 %v774_v59, %v318_v55  ;;  %v551_v0 = vadd.f32 %v798_v60, %v326_v57 }
 0x127   : > { %v776_v2 = vpop.f32.mrf.mxu0  ;;  %v800_v4 = vpop.f32.mrf.mxu1 }
 0x128   : > { %560 = vst.msk [vmem:[#allocation2 + $0x10] sm:$0xff] %vm557_vm1, %v543_v63  ;;  %568 = vst.msk [vmem:[#allocation2 + $0x50] sm:$0xff] %vm557_vm1, %v551_v0  ;;  %v777_v5 = vadd.f32 %v776_v2, %v775_v61  ;;  %v801_v6 = vadd.f32 %v800_v4, %v799_v62 }
 0x129   : > { %v778_v7 = vpop.f32.mrf.mxu0  ;;  %v802_v8 = vpop.f32.mrf.mxu1 }
 0x12a   : > { %v544_v9 = vadd.f32 %v777_v5, %v319_v1  ;;  %v552_v10 = vadd.f32 %v801_v6, %v327_v3 }
 0x12b   : > { %v779_v12 = vpop.f32.mrf.mxu0  ;;  %v803_v14 = vpop.f32.mrf.mxu1 }
 0x12c   : > { %561 = vst.msk [vmem:[#allocation2 + $0x18] sm:$0xff] %vm557_vm1, %v544_v9  ;;  %569 = vst.msk [vmem:[#allocation2 + $0x58] sm:$0xff] %vm557_vm1, %v552_v10  ;;  %v780_v15 = vadd.f32 %v779_v12, %v778_v7  ;;  %v804_v16 = vadd.f32 %v803_v14, %v802_v8 }
 0x12d   : > { %v781_v17 = vpop.f32.mrf.mxu0  ;;  %v805_v18 = vpop.f32.mrf.mxu1 }
 0x12e   : > { %v545_v19 = vadd.f32 %v780_v15, %v320_v11  ;;  %v553_v20 = vadd.f32 %v804_v16, %v328_v13 }
 0x12f   : > { %v782_v22 = vpop.f32.mrf.mxu0  ;;  %v806_v24 = vpop.f32.mrf.mxu1 }
 0x130   : > { %562 = vst.msk [vmem:[#allocation2 + $0x20] sm:$0xff] %vm557_vm1, %v545_v19  ;;  %570 = vst.msk [vmem:[#allocation2 + $0x60] sm:$0xff] %vm557_vm1, %v553_v20  ;;  %v783_v25 = vadd.f32 %v782_v22, %v781_v17  ;;  %v807_v26 = vadd.f32 %v806_v24, %v805_v18 }
 0x131   : > { %v784_v27 = vpop.f32.mrf.mxu0  ;;  %v808_v28 = vpop.f32.mrf.mxu1 }
 0x132   : > { %v546_v29 = vadd.f32 %v783_v25, %v321_v21  ;;  %v554_v30 = vadd.f32 %v807_v26, %v329_v23 }
 0x133   : > { %v785_v32 = vpop.f32.mrf.mxu0  ;;  %v809_v34 = vpop.f32.mrf.mxu1 }
 0x134   : > { %563 = vst.msk [vmem:[#allocation2 + $0x28] sm:$0xff] %vm557_vm1, %v546_v29  ;;  %571 = vst.msk [vmem:[#allocation2 + $0x68] sm:$0xff] %vm557_vm1, %v554_v30  ;;  %v786_v35 = vadd.f32 %v785_v32, %v784_v27  ;;  %v810_v36 = vadd.f32 %v809_v34, %v808_v28 }
 0x135   : > { %v787_v37 = vpop.f32.mrf.mxu0  ;;  %v811_v38 = vpop.f32.mrf.mxu1 }
 0x136   : > { %v547_v39 = vadd.f32 %v786_v35, %v322_v31  ;;  %v555_v40 = vadd.f32 %v810_v36, %v330_v33 }
 0x137   : > { %v788_v42 = vpop.f32.mrf.mxu0  ;;  %v812_v44 = vpop.f32.mrf.mxu1 }
 0x138   : > { %564 = vst.msk [vmem:[#allocation2 + $0x30] sm:$0xff] %vm557_vm1, %v547_v39  ;;  %572 = vst.msk [vmem:[#allocation2 + $0x70] sm:$0xff] %vm557_vm1, %v555_v40  ;;  %v789_v45 = vadd.f32 %v788_v42, %v787_v37  ;;  %v813_v46 = vadd.f32 %v812_v44, %v811_v38  ;;  %577 = sbr.rel (%p727_p11) target bundleno = 329 (0x149), region = 63 }
 0x13a   : > { %v548_v47 = vadd.f32 %v789_v45, %v323_v41  ;;  %v556_v48 = vadd.f32 %v813_v46, %v331_v43 }
 0x13c   : > { %565 = vst.msk [vmem:[#allocation2 + $0x38] sm:$0xff] %vm557_vm1, %v548_v47  ;;  %573 = vst.msk [vmem:[#allocation2 + $0x78] sm:$0xff] %vm557_vm1, %v556_v48 }
 0x13d   : > { %v578_v49 = vld [vmem:[#allocation2] sm:$0xff]  ;;  %v579_v51 = vld [vmem:[#allocation2 + $0x8] sm:$0xff]  ;;  %v580_v54 = vld [vmem:[#allocation2 + $0x10] sm:$0xff] }
 0x13e   : > { %v728_v50 = vld [vmem:[%s1252_s2] ss:$0 sm:$0xff]  ;;  %v581_v55 = vld [vmem:[#allocation2 + $0x18] sm:$0xff]  ;;  %v583_v60 = vld [vmem:[#allocation2 + $0x28] sm:$0xff] }
 0x13f   : > { %v601_v52 = vadd.f32 %v728_v50, %v578_v49  ;;  %v602_v53 = vadd.f32 %v728_v50, %v579_v51  ;;  %v582_v56 = vld [vmem:[#allocation2 + $0x20] sm:$0xff]  ;;  %v603_v57 = vadd.f32 %v728_v50, %v580_v54  ;;  %v604_v58 = vadd.f32 %v728_v50, %v581_v55  ;;  %v584_v61 = vld [vmem:[#allocation2 + $0x30] sm:$0xff]  ;;  %v587_v3 = vld [vmem:[#allocation2 + $0x48] sm:$0xff] }
 0x140   : > { %v605_v59 = vadd.f32 %v728_v50, %v582_v56  ;;  %v606_v63 = vadd.f32 %v728_v50, %v583_v60  ;;  %v607_v0 = vadd.f32 %v728_v50, %v584_v61  ;;  %v586_v2 = vld [vmem:[#allocation2 + $0x40] sm:$0xff]  ;;  %v588_v4 = vld [vmem:[#allocation2 + $0x50] sm:$0xff]  ;;  %v610_v6 = vadd.f32 %v728_v50, %v587_v3  ;;  %v589_v8 = vld [vmem:[#allocation2 + $0x58] sm:$0xff] }
 0x141   : > { %617 = vst.msk [vmem:[%s1253_s3] sm:$0xff] %vm557_vm1, %v601_v52  ;;  %618 = vst.msk [vmem:[%s1253_s3 + $0x8] sm:$0xff] %vm557_vm1, %v602_v53  ;;  %v609_v5 = vadd.f32 %v728_v50, %v586_v2  ;;  %v611_v7 = vadd.f32 %v728_v50, %v588_v4  ;;  %v590_v9 = vld [vmem:[#allocation2 + $0x60] sm:$0xff]  ;;  %v591_v10 = vld [vmem:[#allocation2 + $0x68] sm:$0xff]  ;;  %v612_v11 = vadd.f32 %v728_v50, %v589_v8 }
 0x142   : > { %619 = vst.msk [vmem:[%s1253_s3 + $0x10] sm:$0xff] %vm557_vm1, %v603_v57  ;;  %620 = vst.msk [vmem:[%s1253_s3 + $0x18] sm:$0xff] %vm557_vm1, %v604_v58  ;;  %v613_v12 = vadd.f32 %v728_v50, %v590_v9  ;;  %v614_v13 = vadd.f32 %v728_v50, %v591_v10  ;;  %v592_v14 = vld [vmem:[#allocation2 + $0x70] sm:$0xff] }
 0x143   : > { %v585_v62 = vld [vmem:[#allocation2 + $0x38] sm:$0xff]  ;;  %621 = vst.msk [vmem:[%s1253_s3 + $0x20] sm:$0xff] %vm557_vm1, %v605_v59  ;;  %622 = vst.msk [vmem:[%s1253_s3 + $0x28] sm:$0xff] %vm557_vm1, %v606_v63  ;;  %v615_v16 = vadd.f32 %v728_v50, %v592_v14 }
 0x144   : > { %v608_v1 = vadd.f32 %v728_v50, %v585_v62  ;;  %623 = vst.msk [vmem:[%s1253_s3 + $0x30] sm:$0xff] %vm557_vm1, %v607_v0  ;;  %v593_v15 = vld [vmem:[#allocation2 + $0x78] sm:$0xff]  ;;  %625 = vst.msk [vmem:[%s1253_s3 + $0x40] sm:$0xff] %vm557_vm1, %v609_v5 }
 0x145   : > { %626 = vst.msk [vmem:[%s1253_s3 + $0x48] sm:$0xff] %vm557_vm1, %v610_v6  ;;  %627 = vst.msk [vmem:[%s1253_s3 + $0x50] sm:$0xff] %vm557_vm1, %v611_v7  ;;  %v616_v17 = vadd.f32 %v728_v50, %v593_v15 }
 0x146   : > { %624 = vst.msk [vmem:[%s1253_s3 + $0x38] sm:$0xff] %vm557_vm1, %v608_v1  ;;  %628 = vst.msk [vmem:[%s1253_s3 + $0x58] sm:$0xff] %vm557_vm1, %v612_v11 }
 0x147   : > { %629 = vst.msk [vmem:[%s1253_s3 + $0x60] sm:$0xff] %vm557_vm1, %v613_v12  ;;  %630 = vst.msk [vmem:[%s1253_s3 + $0x68] sm:$0xff] %vm557_vm1, %v614_v13 }
 0x148   : > { %631 = vst.msk [vmem:[%s1253_s3 + $0x70] sm:$0xff] %vm557_vm1, %v615_v16  ;;  %632 = vst.msk [vmem:[%s1253_s3 + $0x78] sm:$0xff] %vm557_vm1, %v616_v17 }
 0x149 PF: > { %s13_s16 = sadd.s32 1, %s925_s16   ;;  %s1254_s12 = smov %s913_s13 }
 0x14a   : > { %p10_p12 = scmp.ge.s32.totalorder %s13_s16, 5   ;;  %s1255_s13 = smov %s983_s20 }
 0x14b   : > { %s1256_s14 = smov %s921_s15  ;;  %s1257_s15 = smov %s1259_s17 }
 0x14c   :  { %12 = sbr.rel (!%p10_p12) target bundleno = 3 (0x3), region = 101 }

// kernel: feature_extractor.11
= control target key start
LH: loop header
LB: loop body
LE: loop exit
PB: predicated region body
PF: predicated region fallthrough
CT: control target
= control target key end

     0   :  { %s413_s6 = smov 0   ;;  %s415_s7 = smov 0   ;;  %s466_s0 = inlined_call_operand.vmem [shape: f32[2,8,8,64], index: 0, kind: input, shape index: {}]   ;;  %s467_s1 = inlined_call_operand.vmem [shape: f32[2,1,1,8], index: 1, kind: output, shape index: {}]  }
   0x1   :  { %s417_s8 = smov 0  }
   0x2 LB: > { %s23_s9 = sadd.s32 1, %s390_s7  ;;  %p335_p0 = scmp.ge.s32.totalorder %s394_s8, 1  ;;  %s394_s8 = sphi %s417_s8, %s11_s8   ;;  %s390_s7 = sphi %s415_s7, %s469_s7   ;;  %s386_s6 = sphi %s413_s6, %s468_s6  }
   0x3   : > { %p25_p1 = scmp.ge.s32.totalorder %s23_s9, 2  ;;  %p108_p2 = scmp.lt.s32.totalorder %s394_s8, 3 }
   0x5   : > { %s471_s9 = smov (%p25_p1, %s23_s9), 0  ;;  %p109_p3 = pnand %p335_p0, %p108_p2 }
   0x6   : > { %p134_p4 = scmp.lt.s32.totalorder (!%p109_p3), %s386_s6, 1  ;;  %s396_s14 = smov (!%p109_p3), 120  }
   0x7   : > { %112 = sbr.rel (%p109_p3) target bundleno = 173 (0xad), region = 24  ;;  %s397_s15 = smov (!%p109_p3), 104  }
   0x8   : > { %s398_s16 = smov (!%p109_p3), 112   ;;  %s399_s17 = smov (!%p109_p3), 96  }
   0x9   : > { %s400_s18 = smov (!%p109_p3), 88   ;;  %s401_s19 = smov (!%p109_p3), 80  }
   0xa   : > { %s402_s20 = smov (!%p109_p3), 72  }
   0xc   : > { %s473_s6 = smov (!%p134_p4, %s386_s6), 1  ;;  %vm157_vm0 = vcmask 523264   ;;  %vm258_vm1 = vcmask 57344  }
   0xd   : > { %s340_s10 = sshll.u32 %s473_s6, 6  ;;  %s148_s23 = scalar_lea.vmem %s467_s1, %s473_s6 }
   0xe   : > { %s141_s13 = scalar_lea.vmem %s466_s0, %s340_s10 }
   0xf   : > { %v149_v0 = vld [vmem:[%s141_s13] sm:$0xff]  ;;  %v150_v1 = vld [vmem:[%s141_s13 + $0x8] sm:$0xff]  ;;  %v151_v2 = vld [vmem:[%s141_s13 + $0x10] sm:$0xff] }
  0x10   : > { %v152_v3 = vld [vmem:[%s141_s13 + $0x18] sm:$0xff]  ;;  %v153_v4 = vld [vmem:[%s141_s13 + $0x20] sm:$0xff]  ;;  %v154_v5 = vld [vmem:[%s141_s13 + $0x28] sm:$0xff]  ;;  %v158_v6 = vsel %vm157_vm0, %v149_v0, -inf  ;;  %v165_v7 = vsel %vm157_vm0, %v150_v1, -inf  ;;  %v172_v8 = vsel %vm157_vm0, %v151_v2, -inf }
  0x11   : > { %v155_v9 = vld [vmem:[%s141_s13 + $0x30] sm:$0xff]  ;;  %v156_v10 = vld [vmem:[%s141_s13 + $0x38] sm:$0xff]  ;;  %v159_v11 = vrot.slane %v158_v6, 4  ;;  %v166_v12 = vrot.slane %v165_v7, 4  ;;  %v173_v13 = vrot.slane %v172_v8, 4  ;;  %v179_v14 = vsel %vm157_vm0, %v152_v3, -inf }
  0x12   : > { %v180_v15 = vrot.slane %v179_v14, 4  ;;  %v186_v16 = vsel %vm157_vm0, %v153_v4, -inf  ;;  %v193_v17 = vsel %vm157_vm0, %v154_v5, -inf  ;;  %v200_v18 = vsel %vm157_vm0, %v155_v9, -inf }
  0x13   : > { %v160_v19 = vmax.f32 %v158_v6, %v159_v11  ;;  %v167_v20 = vmax.f32 %v165_v7, %v166_v12  ;;  %v174_v21 = vmax.f32 %v172_v8, %v173_v13  ;;  %v187_v22 = vrot.slane %v186_v16, 4 }
  0x14   : > { %v181_v23 = vmax.f32 %v179_v14, %v180_v15  ;;  %v194_v24 = vrot.slane %v193_v17, 4  ;;  %v201_v25 = vrot.slane %v200_v18, 4  ;;  %v207_v26 = vsel %vm157_vm0, %v156_v10, -inf }
  0x15   : > { %v161_v27 = vrot.slane %v160_v19, 2  ;;  %v168_v28 = vrot.slane %v167_v20, 2  ;;  %v175_v29 = vrot.slane %v174_v21, 2  ;;  %v188_v30 = vmax.f32 %v186_v16, %v187_v22 }
  0x16   : > { %v182_v31 = vrot.slane %v181_v23, 2  ;;  %v195_v32 = vmax.f32 %v193_v17, %v194_v24  ;;  %v202_v33 = vmax.f32 %v200_v18, %v201_v25  ;;  %v208_v34 = vrot.slane %v207_v26, 4 }
  0x17   : > { %v162_v35 = vmax.f32 %v160_v19, %v161_v27  ;;  %v169_v36 = vmax.f32 %v167_v20, %v168_v28  ;;  %v176_v37 = vmax.f32 %v174_v21, %v175_v29  ;;  %v189_v38 = vrot.slane %v188_v30, 2 }
  0x18   : > { %v183_v39 = vmax.f32 %v181_v23, %v182_v31  ;;  %v196_v40 = vrot.slane %v195_v32, 2  ;;  %v203_v41 = vrot.slane %v202_v33, 2  ;;  %v209_v42 = vmax.f32 %v207_v26, %v208_v34 }
  0x19   : > { %v163_v43 = vrot.slane %v162_v35, 1  ;;  %v170_v44 = vrot.slane %v169_v36, 1  ;;  %v177_v45 = vrot.slane %v176_v37, 1  ;;  %v190_v46 = vmax.f32 %v188_v30, %v189_v38 }
  0x1a   : > { %v184_v47 = vrot.slane %v183_v39, 1  ;;  %v197_v48 = vmax.f32 %v195_v32, %v196_v40  ;;  %v204_v49 = vmax.f32 %v202_v33, %v203_v41  ;;  %v210_v50 = vrot.slane %v209_v42, 2 }
  0x1b   : > { %v164_v51 = vmax.f32 %v162_v35, %v163_v43  ;;  %v171_v52 = vmax.f32 %v169_v36, %v170_v44  ;;  %v178_v53 = vmax.f32 %v176_v37, %v177_v45  ;;  %v191_v54 = vrot.slane %v190_v46, 1 }
  0x1c   : > { %v185_v55 = vmax.f32 %v183_v39, %v184_v47  ;;  %v198_v56 = vrot.slane %v197_v48, 1  ;;  %v205_v57 = vrot.slane %v204_v49, 1  ;;  %v211_v58 = vmax.f32 %v209_v42, %v210_v50 }
  0x1d   : > { %v192_v59 = vmax.f32 %v190_v46, %v191_v54  ;;  %v214_v60 = vsel %vm157_vm0, %v164_v51, -inf  ;;  %v215_v61 = vsel %vm157_vm0, %v171_v52, -inf  ;;  %v216_v1 = vsel %vm157_vm0, %v178_v53, -inf }
  0x1e   : > { %v199_v62 = vmax.f32 %v197_v48, %v198_v56  ;;  %v206_v63 = vmax.f32 %v204_v49, %v205_v57  ;;  %v212_v0 = vrot.slane %v211_v58, 1  ;;  %v217_v2 = vsel %vm157_vm0, %v185_v55, -inf }
  0x1f   : > { %v218_v3 = vsel %vm157_vm0, %v192_v59, -inf }
  0x20   : > { %v213_v4 = vmax.f32 %v211_v58, %v212_v0  ;;  %v219_v5 = vmax.f32 %v214_v60, %v218_v3  ;;  %v220_v6 = vsel %vm157_vm0, %v199_v62, -inf  ;;  %v222_v7 = vsel %vm157_vm0, %v206_v63, -inf }
  0x21   : > { %v221_v8 = vmax.f32 %v215_v61, %v220_v6  ;;  %v223_v9 = vmax.f32 %v216_v1, %v222_v7 }
  0x22   : > { %v224_v10 = vsel %vm157_vm0, %v213_v4, -inf }
  0x23   : > { %v225_v11 = vmax.f32 %v217_v2, %v224_v10  ;;  %v226_v12 = vmax.f32 %v219_v5, %v221_v8 }
  0x25   : > { %v227_v13 = vmax.f32 %v223_v9, %v225_v11 }
  0x27   : > { %v228_v14 = vmax.f32 %v226_v12, %v227_v13 }
  0x29   : > { %230 = vrot.lane.b32.xlu0 %v228_v14, %s396_s14  ;;  %238 = vrot.lane.b32.xlu1 %v228_v14, %s397_s15 }
  0x2d   : > { %234 = vrot.lane.b32.xlu0 %v228_v14, %s398_s16  ;;  %242 = vrot.lane.b32.xlu1 %v228_v14, %s399_s17 }
  0x31   : > { %246 = vrot.lane.b32.xlu0 %v228_v14, %s400_s18  ;;  %250 = vrot.lane.b32.xlu1 %v228_v14, %s401_s19 }
  0x35   : > { %254 = vrot.lane.b32.xlu0 %v228_v14, %s402_s20 }
  0x9b   : > { %v231_v15 = vpop.permute.xlu0 %230  ;;  %v239_v16 = vpop.permute.xlu1 %238 }
  0x9c   : > { %v233_v17 = vmax.f32 %v228_v14, %v231_v15 }
  0x9f   : > { %v235_v18 = vpop.permute.xlu0 %234  ;;  %v243_v19 = vpop.permute.xlu1 %242 }
  0xa0   : > { %v237_v20 = vmax.f32 %v233_v17, %v235_v18 }
  0xa2   : > { %v241_v21 = vmax.f32 %v237_v20, %v239_v16 }
  0xa3   : > { %v247_v22 = vpop.permute.xlu0 %246  ;;  %v251_v24 = vpop.permute.xlu1 %250 }
  0xa4   : > { %v245_v23 = vmax.f32 %v241_v21, %v243_v19 }
  0xa6   : > { %v249_v25 = vmax.f32 %v245_v23, %v247_v22 }
  0xa7   : > { %v255_v26 = vpop.permute.xlu0 %254 }
  0xa8   : > { %v253_v27 = vmax.f32 %v249_v25, %v251_v24 }
  0xaa   : > { %v257_v28 = vmax.f32 %v253_v27, %v255_v26 }
  0xac   : > { %259 = vst.msk [vmem:[%s148_s23] sm:$0x1] %vm258_vm1, %v257_v28 }
  0xad PF: > { %s11_s8 = sadd.s32 1, %s394_s8   ;;  %s468_s6 = smov %s390_s7 }
  0xae   : > { %p8_p5 = scmp.ge.s32.totalorder %s11_s8, 4   ;;  %s469_s7 = smov %s471_s9 }
  0xb0   :  { %10 = sbr.rel (!%p8_p5) target bundleno = 2 (0x2), region = 54 }

// kernel: feature_extractor.12
= control target key start
LH: loop header
LB: loop body
LE: loop exit
PB: predicated region body
PF: predicated region fallthrough
CT: control target
= control target key end

     0   :  { %s345_s6 = smov 0   ;;  %s347_s7 = smov 0   ;;  %s382_s0 = inlined_call_operand.vmem [shape: f32[2,4,4,128], index: 0, kind: input, shape index: {}]   ;;  %s383_s1 = inlined_call_operand.vmem [shape: f32[2,1,1,32], index: 1, kind: output, shape index: {}]  }
   0x1   :  { %s349_s8 = smov 0  }
   0x2 LB: > { %s23_s9 = sadd.s32 1, %s326_s7  ;;  %p275_p0 = scmp.ge.s32.totalorder %s330_s8, 1  ;;  %s330_s8 = sphi %s349_s8, %s11_s8   ;;  %s326_s7 = sphi %s347_s7, %s385_s7   ;;  %s322_s6 = sphi %s345_s6, %s384_s6  }
   0x3   : > { %p25_p1 = scmp.ge.s32.totalorder %s23_s9, 2  ;;  %p108_p2 = scmp.lt.s32.totalorder %s330_s8, 3 }
   0x5   : > { %s387_s9 = smov (%p25_p1, %s23_s9), 0  ;;  %p109_p3 = pnand %p275_p0, %p108_p2 }
   0x6   : > { %p134_p4 = scmp.lt.s32.totalorder (!%p109_p3), %s322_s6, 1  ;;  %s332_s14 = smov (!%p109_p3), 96  }
   0x7   : > { %112 = sbr.rel (%p109_p3) target bundleno = 158 (0x9e), region = 24  ;;  %s333_s15 = smov (!%p109_p3), 32  }
   0x8   : > { %s334_s16 = smov (!%p109_p3), 64  }
   0xc   : > { %s389_s6 = smov (!%p134_p4, %s322_s6), 1  ;;  %vm153_vm0 = vcmask 1043456   ;;  %vm198_vm1 = vcmask 253952  }
   0xd   : > { %s280_s10 = sshll.u32 %s389_s6, 4  ;;  %s148_s19 = scalar_lea.vmem %s383_s1, %s389_s6 }
   0xe   : > { %s141_s13 = scalar_lea.vmem %s382_s0, %s280_s10 }
   0xf   : > { %v149_v0 = vld [vmem:[%s141_s13] sm:$0xf]  ;;  %v150_v1 = vld [vmem:[%s141_s13 + $0x4] sm:$0xf]  ;;  %v151_v2 = vld [vmem:[%s141_s13 + $0x8] sm:$0xf] }
  0x10   : > { %v152_v3 = vld [vmem:[%s141_s13 + $0xc] sm:$0xf]  ;;  %v154_v4 = vsel %vm153_vm0, %v149_v0, -inf  ;;  %v161_v5 = vsel %vm153_vm0, %v150_v1, -inf  ;;  %v168_v6 = vsel %vm153_vm0, %v151_v2, -inf }
  0x11   : > { %v155_v7 = vrot.slane %v154_v4, 4  ;;  %v162_v8 = vrot.slane %v161_v5, 4  ;;  %v169_v9 = vrot.slane %v168_v6, 4  ;;  %v175_v10 = vsel %vm153_vm0, %v152_v3, -inf }
  0x12   : > { %v176_v11 = vrot.slane %v175_v10, 4 }
  0x13   : > { %v156_v12 = vmax.f32 %v154_v4, %v155_v7  ;;  %v163_v13 = vmax.f32 %v161_v5, %v162_v8  ;;  %v170_v14 = vmax.f32 %v168_v6, %v169_v9 }
  0x14   : > { %v177_v15 = vmax.f32 %v175_v10, %v176_v11 }
  0x15   : > { %v157_v16 = vrot.slane %v156_v12, 2  ;;  %v164_v17 = vrot.slane %v163_v13, 2  ;;  %v171_v18 = vrot.slane %v170_v14, 2 }
  0x16   : > { %v178_v19 = vrot.slane %v177_v15, 2 }
  0x17   : > { %v158_v20 = vmax.f32 %v156_v12, %v157_v16  ;;  %v165_v21 = vmax.f32 %v163_v13, %v164_v17  ;;  %v172_v22 = vmax.f32 %v170_v14, %v171_v18 }
  0x18   : > { %v179_v23 = vmax.f32 %v177_v15, %v178_v19 }
  0x19   : > { %v159_v24 = vrot.slane %v158_v20, 1  ;;  %v166_v25 = vrot.slane %v165_v21, 1  ;;  %v173_v26 = vrot.slane %v172_v22, 1 }
  0x1a   : > { %v180_v27 = vrot.slane %v179_v23, 1 }
  0x1b   : > { %v160_v28 = vmax.f32 %v158_v20, %v159_v24  ;;  %v167_v29 = vmax.f32 %v165_v21, %v166_v25  ;;  %v174_v30 = vmax.f32 %v172_v22, %v173_v26 }
  0x1c   : > { %v181_v31 = vmax.f32 %v179_v23, %v180_v27 }
  0x1d   : > { %v182_v32 = vmax.f32 %v160_v28, %v167_v29 }
  0x1e   : > { %v183_v33 = vmax.f32 %v174_v30, %v181_v31 }
  0x20   : > { %v184_v34 = vmax.f32 %v182_v32, %v183_v33 }
  0x22   : > { %186 = vrot.lane.b32.xlu0 %v184_v34, %s332_s14  ;;  %194 = vrot.lane.b32.xlu1 %v184_v34, %s333_s15 }
  0x26   : > { %190 = vrot.lane.b32.xlu0 %v184_v34, %s334_s16 }
  0x94   : > { %v187_v35 = vpop.permute.xlu0 %186  ;;  %v195_v38 = vpop.permute.xlu1 %194 }
  0x95   : > { %v189_v36 = vmax.f32 %v184_v34, %v187_v35 }
  0x98   : > { %v191_v37 = vpop.permute.xlu0 %190 }
  0x99   : > { %v193_v39 = vmax.f32 %v189_v36, %v191_v37 }
  0x9b   : > { %v197_v40 = vmax.f32 %v193_v39, %v195_v38 }
  0x9d   : > { %199 = vst.msk [vmem:[%s148_s19] sm:$0x1] %vm198_vm1, %v197_v40 }
  0x9e PF: > { %s11_s8 = sadd.s32 1, %s330_s8   ;;  %s384_s6 = smov %s326_s7 }
  0x9f   : > { %p8_p5 = scmp.ge.s32.totalorder %s11_s8, 4   ;;  %s385_s7 = smov %s387_s9 }
  0xa1   :  { %10 = sbr.rel (!%p8_p5) target bundleno = 2 (0x2), region = 54 }

// kernel: feature_extractor.9
= control target key start
LH: loop header
LB: loop body
LE: loop exit
PB: predicated region body
PF: predicated region fallthrough
CT: control target
= control target key end

     0   :  { %s694_s12 = smov 0   ;;  %s696_s13 = smov 0   ;;  %s820_s0 = inlined_call_operand.vmem [shape: f32[32,768], index: 0, kind: input, shape index: {}]   ;;  %s821_s1 = inlined_call_operand.vmem [shape: f32[768,128], index: 1, kind: input, shape index: {}]   ;;  %s822_s2 = inlined_call_operand.vmem [shape: f32[1,128], index: 2, kind: input, shape index: {}]   ;;  %s823_s3 = inlined_call_operand.vmem [shape: f32[32,128], index: 3, kind: output, shape index: {}]  }
   0x1   :  { %s698_s14 = smov 0   ;;  %s700_s15 = smov 0  }
   0x2   :  { %s702_s16 = smov 0  }
   0x3 LB: > { %s22_s17 = sadd.s32 1, %s667_s15  ;;  %p41_p1 = scmp.ne.s32.totalorder %s659_s13, %s655_s12  ;;  %s671_s16 = sphi %s702_s16, %s13_s16   ;;  %s667_s15 = sphi %s700_s15, %s827_s15   ;;  %s663_s14 = sphi %s698_s14, %s826_s14   ;;  %s659_s13 = sphi %s696_s13, %s825_s13   ;;  %s655_s12 = sphi %s694_s12, %s824_s12  }
   0x4   : > { %p23_p0 = scmp.ge.s32.totalorder %s22_s17, 3  ;;  %p42_p2 = scmp.eq.s32.totalorder %s671_s16, 0 }
   0x5   : > { %s34_s19 = sadd.s32 1, %s659_s13  ;;  %p500_p5 = scmp.ge.s32.totalorder %s671_s16, 3 }
   0x6   : > { %s829_s17 = smov (%p23_p0, %s22_s17), 0  ;;  %p43_p3 = por %p42_p2, %p41_p1 }
   0x7   : > { %s30_s18 = ssub.s32 %s667_s15, %s829_s17  ;;  %143 = sbr.rel (%p500_p5) target bundleno = 20 (0x14), region = 20 }
   0x8   : > { %p32_p4 = scmp.eq.s32.totalorder %s30_s18, 0 }
   0xa   : > { %s729_s20 = scalar_select %p32_p4, %s659_s13, %s34_s19  }
   0xc   : > { %146 = sbr.rel (!%p43_p3) target bundleno = 20 (0x14), region = 24  ;;  %s148_s21 = sand.u32 (%p43_p3), 1, %s659_s13  }
   0xd   : > { %s515_s22 = sshll.u32 (%p43_p3), %s667_s15, 4  ;;  %s501_s23 = sshll.u32 (%p43_p3), %s148_s21, 6 }
   0xe   : > { %s156_s26 = scalar_lea.vmem (%p43_p3), %s820_s0, %s515_s22  ;;  %s150_s27 = scalar_lea.vmem (%p43_p3), [#allocation3], %s501_s23 }
   0xf   : > { %v169_v0 = vld [vmem:[%s156_s26] sm:$0xff] (%p43_p3)  ;;  %v171_v1 = vld [vmem:[%s156_s26 + $0x8] sm:$0xff] (%p43_p3)  ;;  %v173_v2 = vld [vmem:[%s156_s26 + $0x30] sm:$0xff] (%p43_p3) }
  0x10   : > { %170 = vst [vmem:[%s150_s27] sm:$0xff] (%p43_p3), %v169_v0  ;;  %172 = vst [vmem:[%s150_s27 + $0x8] sm:$0xff] (%p43_p3), %v171_v1  ;;  %v175_v3 = vld [vmem:[%s156_s26 + $0x38] sm:$0xff] (%p43_p3)  ;;  %v177_v4 = vld [vmem:[%s156_s26 + $0x60] sm:$0xff] (%p43_p3) }
  0x11   : > { %174 = vst [vmem:[%s150_s27 + $0x10] sm:$0xff] %v173_v2  ;;  %v179_v5 = vld [vmem:[%s156_s26 + $0x68] sm:$0xff]  ;;  %176 = vst [vmem:[%s150_s27 + $0x18] sm:$0xff] %v175_v3  ;;  %v181_v6 = vld [vmem:[%s156_s26 + $0x90] sm:$0xff] }
  0x12   : > { %178 = vst [vmem:[%s150_s27 + $0x20] sm:$0xff] %v177_v4  ;;  %180 = vst [vmem:[%s150_s27 + $0x28] sm:$0xff] %v179_v5  ;;  %v183_v7 = vld [vmem:[%s156_s26 + $0x98] sm:$0xff] }
  0x13   : > { %182 = vst [vmem:[%s150_s27 + $0x30] sm:$0xff] %v181_v6  ;;  %184 = vst [vmem:[%s150_s27 + $0x38] sm:$0xff] %v183_v7 }
  0x14 PF: > { %p504_p6 = scmp.ge.s32.totalorder %s671_s16, 1  ;;  %p198_p7 = scmp.lt.s32.totalorder %s671_s16, 4 }
  0x16   : > { %p199_p8 = pnand %p504_p6, %p198_p7 }
  0x17   : > { %s205_s28 = sand.u32 (!%p199_p8), 1, %s655_s12   ;;  %s506_s29 = sshll.u32 (!%p199_p8), %s663_s14, 5 }
  0x18   : > { %202 = sbr.rel (%p199_p8) target bundleno = 285 (0x11d), region = 51  ;;  %s505_s30 = sshll.u32 (!%p199_p8), %s205_s28, 6 }
  0x19   : > { %p236_p9 = scmp.lt.s32.totalorder (!%p199_p8), %s506_s29, 95  ;;  %s746_s8 = scalar_lea.vmem (!%p199_p8), [#allocation3], %s505_s30 }
  0x1a   : > { %p508_p10 = scmp.ne.s32.totalorder (!%p199_p8), %s663_s14, 0 }
  0x1d   : > { %s831_s29 = smov (!%p236_p9, %s506_s29), 95  ;;  %250 = sbr.rel (%p508_p10) target bundleno = 37 (0x25), region = 59 }
  0x1e   : > { %s507_s4 = sshll.u32 %s831_s29, 3 }
  0x1f   : > { %s744_s7 = scalar_lea.vmem %s821_s1, %s507_s4 }
  0x22   : > { %v673_v8 = vmov 0.0  }
  0x23   : > { %251 = vst [vmem:[#allocation2 + $0x10] sm:$0xff] %v673_v8  ;;  %252 = vst [vmem:[#allocation2] sm:$0xff] %v673_v8 }
  0x24   : > { %253 = vst [vmem:[#allocation2 + $0x18] sm:$0xff] %v673_v8  ;;  %254 = vst [vmem:[#allocation2 + $0x8] sm:$0xff] %v673_v8 }
  0x25 PF: > { %v298_v9 = vld [vmem:[%s744_s7 + $0xf8] sm:$0xff]  ;;  %v297_v11 = vld [vmem:[%s744_s7 + $0xf0] sm:$0xff]  ;;  %v296_v13 = vld [vmem:[%s744_s7 + $0xe8] sm:$0xff]  ;;  %p509_p11 = scmp.ne.s32.totalorder %s663_s14, 2 }
  0x26   : > { %v282_v10 = vld [vmem:[%s744_s7 + $0x78] sm:$0xff]  ;;  %516 = vmatprep.subr.mxu0 %v298_v9  ;;  %560 = vmatprep.subr.mxu1 %v298_v9  ;;  %v281_v12 = vld [vmem:[%s744_s7 + $0x70] sm:$0xff]  ;;  %v280_v14 = vld [vmem:[%s744_s7 + $0x68] sm:$0xff] }
  0x27   : > { %517 = vmatpush3.msra.mxu0 %v282_v10  ;;  %576 = vmatpush3.msra.mxu1 %v282_v10  ;;  %v295_v15 = vld [vmem:[%s744_s7 + $0xe0] sm:$0xff]  ;;  %v294_v17 = vld [vmem:[%s744_s7 + $0xd8] sm:$0xff]  ;;  %v293_v19 = vld [vmem:[%s744_s7 + $0xd0] sm:$0xff] }
  0x28   : > { %518 = vmatprep.subr.mxu0 %v297_v11  ;;  %561 = vmatprep.subr.mxu1 %v297_v11  ;;  %v279_v16 = vld [vmem:[%s744_s7 + $0x60] sm:$0xff]  ;;  %v278_v18 = vld [vmem:[%s744_s7 + $0x58] sm:$0xff]  ;;  %v277_v20 = vld [vmem:[%s744_s7 + $0x50] sm:$0xff] }
  0x29   : > { %519 = vmatpush3.msra.mxu0 %v281_v12  ;;  %577 = vmatpush3.msra.mxu1 %v281_v12  ;;  %v292_v21 = vld [vmem:[%s744_s7 + $0xc8] sm:$0xff]  ;;  %v291_v23 = vld [vmem:[%s744_s7 + $0xc0] sm:$0xff]  ;;  %v290_v25 = vld [vmem:[%s744_s7 + $0xb8] sm:$0xff] }
  0x2a   : > { %520 = vmatprep.subr.mxu0 %v296_v13  ;;  %562 = vmatprep.subr.mxu1 %v296_v13  ;;  %v276_v22 = vld [vmem:[%s744_s7 + $0x48] sm:$0xff]  ;;  %v275_v24 = vld [vmem:[%s744_s7 + $0x40] sm:$0xff]  ;;  %v274_v26 = vld [vmem:[%s744_s7 + $0x38] sm:$0xff] }
  0x2b   : > { %521 = vmatpush3.msra.mxu0 %v280_v14  ;;  %578 = vmatpush3.msra.mxu1 %v280_v14  ;;  %v289_v27 = vld [vmem:[%s744_s7 + $0xb0] sm:$0xff]  ;;  %v288_v29 = vld [vmem:[%s744_s7 + $0xa8] sm:$0xff]  ;;  %v287_v31 = vld [vmem:[%s744_s7 + $0xa0] sm:$0xff] }
  0x2c   : > { %522 = vmatprep.subr.mxu0 %v295_v15  ;;  %563 = vmatprep.subr.mxu1 %v295_v15  ;;  %v273_v28 = vld [vmem:[%s744_s7 + $0x30] sm:$0xff]  ;;  %v272_v30 = vld [vmem:[%s744_s7 + $0x28] sm:$0xff]  ;;  %v271_v32 = vld [vmem:[%s744_s7 + $0x20] sm:$0xff] }
  0x2d   : > { %523 = vmatpush3.msra.mxu0 %v279_v16  ;;  %579 = vmatpush3.msra.mxu1 %v279_v16  ;;  %v286_v33 = vld [vmem:[%s744_s7 + $0x98] sm:$0xff]  ;;  %v285_v35 = vld [vmem:[%s744_s7 + $0x90] sm:$0xff]  ;;  %v284_v37 = vld [vmem:[%s744_s7 + $0x88] sm:$0xff] }
  0x2e   : > { %524 = vmatprep.subr.mxu0 %v294_v17  ;;  %564 = vmatprep.subr.mxu1 %v294_v17  ;;  %v270_v34 = vld [vmem:[%s744_s7 + $0x18] sm:$0xff]  ;;  %v269_v36 = vld [vmem:[%s744_s7 + $0x10] sm:$0xff]  ;;  %v268_v38 = vld [vmem:[%s744_s7 + $0x8] sm:$0xff] }
  0x2f   : > { %525 = vmatpush3.msra.mxu0 %v278_v18  ;;  %580 = vmatpush3.msra.mxu1 %v278_v18  ;;  %v283_v39 = vld [vmem:[%s744_s7 + $0x80] sm:$0xff]  ;;  %v260_v41 = vld [vmem:[%s746_s8 + $0x8] sm:$0xff]  ;;  %v262_v45 = vld [vmem:[%s746_s8 + $0x18] sm:$0xff] }
  0x30   : > { %526 = vmatprep.subr.mxu0 %v293_v19  ;;  %565 = vmatprep.subr.mxu1 %v293_v19  ;;  %v267_v40 = vld [vmem:[%s744_s7] sm:$0xff]  ;;  %v264_v42 = vld [vmem:[%s746_s8 + $0x28] sm:$0xff]  ;;  %v266_v46 = vld [vmem:[%s746_s8 + $0x38] sm:$0xff] }
  0x31   : > { %527 = vmatpush3.msra.mxu0 %v277_v20  ;;  %581 = vmatpush3.msra.mxu1 %v277_v20  ;;  %v259_v43 = vld [vmem:[%s746_s8] sm:$0xff]  ;;  %v261_v47 = vld [vmem:[%s746_s8 + $0x10] sm:$0xff]  ;;  %v257_v53 = vld [vmem:[#allocation2 + $0x18] sm:$0xff] }
  0x32   : > { %528 = vmatprep.subr.mxu0 %v292_v21  ;;  %566 = vmatprep.subr.mxu1 %v292_v21  ;;  %v263_v44 = vld [vmem:[%s746_s8 + $0x20] sm:$0xff]  ;;  %v265_v48 = vld [vmem:[%s746_s8 + $0x30] sm:$0xff]  ;;  %v258_v63 = vld [vmem:[#allocation2 + $0x8] sm:$0xff] }
  0x33   : > { %529 = vmatpush3.msra.mxu0 %v276_v22  ;;  %582 = vmatpush3.msra.mxu1 %v276_v22  ;;  %v255_v51 = vld [vmem:[#allocation2 + $0x10] sm:$0xff]  ;;  %v256_v61 = vld [vmem:[#allocation2] sm:$0xff] }
  0x34   : > { %530 = vmatprep.subr.mxu0 %v291_v23  ;;  %567 = vmatprep.subr.mxu1 %v291_v23 }
  0x35   : > { %531 = vmatpush3.msra.mxu0 %v275_v24  ;;  %583 = vmatpush3.msra.mxu1 %v275_v24 }
  0x36   : > { %532 = vmatprep.subr.mxu0 %v290_v25  ;;  %568 = vmatprep.subr.mxu1 %v290_v25 }
  0x37   : > { %533 = vmatpush3.msra.mxu0 %v274_v26  ;;  %584 = vmatpush3.msra.mxu1 %v274_v26 }
  0x38   : > { %534 = vmatprep.subr.mxu0 %v289_v27  ;;  %569 = vmatprep.subr.mxu1 %v289_v27 }
  0x39   : > { %535 = vmatpush3.msra.mxu0 %v273_v28  ;;  %585 = vmatpush3.msra.mxu1 %v273_v28 }
  0x3a   : > { %536 = vmatprep.subr.mxu0 %v288_v29  ;;  %570 = vmatprep.subr.mxu1 %v288_v29 }
  0x3b   : > { %537 = vmatpush3.msra.mxu0 %v272_v30  ;;  %586 = vmatpush3.msra.mxu1 %v272_v30 }
  0x3c   : > { %538 = vmatprep.subr.mxu0 %v287_v31  ;;  %571 = vmatprep.subr.mxu1 %v287_v31 }
  0x3d   : > { %539 = vmatpush3.msra.mxu0 %v271_v32  ;;  %587 = vmatpush3.msra.mxu1 %v271_v32 }
  0x3e   : > { %540 = vmatprep.subr.mxu0 %v286_v33  ;;  %572 = vmatprep.subr.mxu1 %v286_v33 }
  0x3f   : > { %541 = vmatpush3.msra.mxu0 %v270_v34  ;;  %588 = vmatpush3.msra.mxu1 %v270_v34 }
  0x40   : > { %542 = vmatprep.subr.mxu0 %v285_v35  ;;  %573 = vmatprep.subr.mxu1 %v285_v35 }
  0x41   : > { %543 = vmatpush3.msra.mxu0 %v269_v36  ;;  %589 = vmatpush3.msra.mxu1 %v269_v36 }
  0x42   : > { %544 = vmatprep.subr.mxu0 %v284_v37  ;;  %574 = vmatprep.subr.mxu1 %v284_v37 }
  0x43   : > { %545 = vmatpush3.msra.mxu0 %v268_v38  ;;  %590 = vmatpush3.msra.mxu1 %v268_v38 }
  0x44   : > { %546 = vmatprep.subr.mxu0 %v283_v39  ;;  %575 = vmatprep.subr.mxu1 %v283_v39 }
  0x45   : > { %547 = vmatpush3.msra.mxu0 %v267_v40  ;;  %591 = vmatpush3.msra.mxu1 %v267_v40 }
  0x46   : > { %363 = vmatprep.mubr.f32.mxu0 %v260_v41  ;;  %373 = vmatprep.mubr.f32.mxu1 %v264_v42 }
  0x47   : > { %364 = vmatmul.mubr.f32.vlgmr.msra.gmra.mxu0 %v259_v43  ;;  %374 = vmatmul.mubr.f32.vlgmr.msra.gmra.mxu1 %v263_v44 }
  0x48   : > { %368 = vmatprep.mubr.f32.mxu0 %v262_v45  ;;  %378 = vmatprep.mubr.f32.mxu1 %v266_v46 }
  0x4b   : > { %369 = vmatmul.mubr.f32.gmra.mxu0 %v261_v47  ;;  %379 = vmatmul.mubr.f32.gmra.mxu1 %v265_v48 }
 0x107   : > { %v548_v49 = vpop.f32.mrf.mxu0  ;;  %v554_v50 = vpop.f32.mrf.mxu1 }
 0x109   : > { %v549_v52 = vpop.f32.mrf.mxu0  ;;  %v555_v54 = vpop.f32.mrf.mxu1 }
 0x10a   : > { %v550_v55 = vadd.f32 %v549_v52, %v548_v49  ;;  %v556_v56 = vadd.f32 %v555_v54, %v554_v50 }
 0x10b   : > { %v551_v57 = vpop.f32.mrf.mxu0  ;;  %v557_v58 = vpop.f32.mrf.mxu1 }
 0x10c   : > { %v384_v59 = vadd.f32 %v550_v55, %v255_v51  ;;  %v386_v60 = vadd.f32 %v556_v56, %v257_v53 }
 0x10d   : > { %v552_v62 = vpop.f32.mrf.mxu0  ;;  %v558_v0 = vpop.f32.mrf.mxu1 }
 0x10e   : > { %388 = vst [vmem:[#allocation2 + $0x10] sm:$0xff] %v384_v59  ;;  %390 = vst [vmem:[#allocation2 + $0x18] sm:$0xff] %v386_v60  ;;  %v553_v1 = vadd.f32 %v552_v62, %v551_v57  ;;  %v559_v2 = vadd.f32 %v558_v0, %v557_v58  ;;  %395 = sbr.rel (%p509_p11) target bundleno = 285 (0x11d), region = 63 }
 0x110   : > { %v385_v3 = vadd.f32 %v553_v1, %v256_v61  ;;  %v387_v4 = vadd.f32 %v559_v2, %v258_v63 }
 0x112   : > { %389 = vst [vmem:[#allocation2] sm:$0xff] %v385_v3  ;;  %391 = vst [vmem:[#allocation2 + $0x8] sm:$0xff] %v387_v4 }
 0x113   : > { %v510_v6 = vld [vmem:[%s822_s2] ss:$0 sm:$0xff] }
 0x115   : > { %v396_v5 = vld [vmem:[#allocation2 + $0x10] sm:$0xff]  ;;  %v398_v10 = vld [vmem:[#allocation2 + $0x18] sm:$0xff] }
 0x116   : > { %v407_v8 = vadd.f32 %v510_v6, %v396_v5  ;;  %v409_v12 = vadd.f32 %v510_v6, %v398_v10 }
 0x118   : > { %411 = vst [vmem:[%s823_s3] sm:$0xff] %v407_v8  ;;  %413 = vst [vmem:[%s823_s3 + $0x10] sm:$0xff] %v409_v12 }
 0x119   : > { %v397_v7 = vld [vmem:[#allocation2] sm:$0xff]  ;;  %v399_v11 = vld [vmem:[#allocation2 + $0x8] sm:$0xff] }
 0x11a   : > { %v408_v9 = vadd.f32 %v510_v6, %v397_v7  ;;  %v410_v13 = vadd.f32 %v510_v6, %v399_v11 }
 0x11c   : > { %412 = vst [vmem:[%s823_s3 + $0x8] sm:$0xff] %v408_v9  ;;  %414 = vst [vmem:[%s823_s3 + $0x18] sm:$0xff] %v410_v13 }
 0x11d PF: > { %s13_s16 = sadd.s32 1, %s671_s16   ;;  %s824_s12 = smov %s659_s13 }
 0x11e   : > { %p10_p12 = scmp.ge.s32.totalorder %s13_s16, 5   ;;  %s825_s13 = smov %s729_s20 }
 0x11f   : > { %s826_s14 = smov %s667_s15  ;;  %s827_s15 = smov %s829_s17 }
 0x120   :  { %12 = sbr.rel (!%p10_p12) target bundleno = 3 (0x3), region = 101 }

// kernel: feature_extractor.13
= control target key start
LH: loop header
LB: loop body
LE: loop exit
PB: predicated region body
PF: predicated region fallthrough
CT: control target
= control target key end

     0   :  { %s353_s6 = smov 0   ;;  %s355_s7 = smov 0   ;;  %s390_s0 = inlined_call_operand.vmem [shape: f32[2,2,2,256], index: 0, kind: input, shape index: {}]   ;;  %s391_s1 = inlined_call_operand.vmem [shape: f32[2,1,1,128], index: 1, kind: output, shape index: {}]  }
   0x1   :  { %s357_s8 = smov 0  }
   0x2 LB: > { %s23_s9 = sadd.s32 1, %s337_s7  ;;  %p287_p0 = scmp.ge.s32.totalorder %s341_s8, 1  ;;  %s341_s8 = sphi %s357_s8, %s11_s8   ;;  %s337_s7 = sphi %s355_s7, %s393_s7   ;;  %s333_s6 = sphi %s353_s6, %s392_s6  }
   0x3   : > { %p25_p1 = scmp.ge.s32.totalorder %s23_s9, 2  ;;  %p109_p2 = scmp.lt.s32.totalorder %s341_s8, 3 }
   0x5   : > { %s395_s9 = smov (%p25_p1, %s23_s9), 0  ;;  %p110_p3 = pnand %p287_p0, %p109_p2 }
   0x6   : > { %p136_p4 = scmp.lt.s32.totalorder (!%p110_p3), %s333_s6, 1 }
   0x7   : > { %113 = sbr.rel (%p110_p3) target bundleno = 37 (0x25), region = 24 }
   0xc   : > { %s397_s6 = smov (!%p136_p4, %s333_s6), 1  ;;  %vm176_vm0 = vcmask 1041408  }
   0xd   : > { %s294_s10 = sshll.u32 %s397_s6, 3  ;;  %s151_s16 = scalar_lea.vmem %s391_s1, %s397_s6 }
   0xe   : > { %s144_s13 = scalar_lea.vmem %s390_s0, %s294_s10 }
   0xf   : > { %v290_v0 = vld.sshfl [vmem:[%s144_s13] sm:$0x33 pattern:$0x76325410] }
  0x10   : > { %v291_v1 = vld.sshfl [vmem:[%s144_s13 + $0x4] sm:$0x33 pattern:$0x76325410]  ;;  %v163_v2 = vcombine.high %v290_v0, %v290_v0  ;;  %v177_v3 = vsel %vm176_vm0, %v290_v0, -inf }
  0x11   : > { %v171_v4 = vcombine.high %v291_v1, %v291_v1  ;;  %v178_v5 = vrot.slane %v177_v3, 4  ;;  %v191_v6 = vsel %vm176_vm0, %v291_v1, -inf }
  0x12   : > { %v184_v7 = vsel %vm176_vm0, %v163_v2, -inf  ;;  %v192_v8 = vrot.slane %v191_v6, 4 }
  0x13   : > { %v179_v9 = vmax.f32 %v177_v3, %v178_v5  ;;  %v185_v10 = vrot.slane %v184_v7, 4  ;;  %v198_v11 = vsel %vm176_vm0, %v171_v4, -inf }
  0x14   : > { %v193_v12 = vmax.f32 %v191_v6, %v192_v8  ;;  %v199_v13 = vrot.slane %v198_v11, 4 }
  0x15   : > { %v180_v14 = vrot.slane %v179_v9, 2  ;;  %v186_v15 = vmax.f32 %v184_v7, %v185_v10 }
  0x16   : > { %v194_v16 = vrot.slane %v193_v12, 2  ;;  %v200_v17 = vmax.f32 %v198_v11, %v199_v13 }
  0x17   : > { %v181_v18 = vmax.f32 %v179_v9, %v180_v14  ;;  %v187_v19 = vrot.slane %v186_v15, 2 }
  0x18   : > { %v195_v20 = vmax.f32 %v193_v12, %v194_v16  ;;  %v201_v21 = vrot.slane %v200_v17, 2 }
  0x19   : > { %v182_v22 = vrot.slane %v181_v18, 1  ;;  %v188_v23 = vmax.f32 %v186_v15, %v187_v19 }
  0x1a   : > { %v196_v24 = vrot.slane %v195_v20, 1  ;;  %v202_v25 = vmax.f32 %v200_v17, %v201_v21 }
  0x1b   : > { %v183_v26 = vmax.f32 %v181_v18, %v182_v22  ;;  %v189_v27 = vrot.slane %v188_v23, 1 }
  0x1c   : > { %v197_v28 = vmax.f32 %v195_v20, %v196_v24  ;;  %v203_v29 = vrot.slane %v202_v25, 1 }
  0x1d   : > { %v190_v30 = vmax.f32 %v188_v23, %v189_v27 }
  0x1e   : > { %v204_v31 = vmax.f32 %v202_v25, %v203_v29  ;;  %v205_v32 = vmax.f32 %v183_v26, %v197_v28 }
  0x20   : > { %v206_v33 = vmax.f32 %v190_v30, %v204_v31 }
  0x22   : > { %v207_v34 = vmax.f32 %v205_v32, %v206_v33 }
  0x24   : > { %208 = vst [vmem:[%s151_s16] sm:$0x1] %v207_v34 }
  0x25 PF: > { %s11_s8 = sadd.s32 1, %s341_s8   ;;  %s392_s6 = smov %s337_s7 }
  0x26   : > { %p8_p5 = scmp.ge.s32.totalorder %s11_s8, 4   ;;  %s393_s7 = smov %s395_s9 }
  0x28   :  { %10 = sbr.rel (!%p8_p5) target bundleno = 2 (0x2), region = 54 }

// kernel: feature_extractor.10
= control target key start
LH: loop header
LB: loop body
LE: loop exit
PB: predicated region body
PF: predicated region fallthrough
CT: control target
= control target key end

     0   :  { %s559_s12 = smov 0   ;;  %s561_s13 = smov 0   ;;  %s677_s0 = inlined_call_operand.vmem [shape: f32[8,1280], index: 0, kind: input, shape index: {}]   ;;  %s678_s1 = inlined_call_operand.vmem [shape: f32[1280,256], index: 1, kind: input, shape index: {}]   ;;  %s679_s2 = inlined_call_operand.vmem [shape: f32[1,256], index: 2, kind: input, shape index: {}]   ;;  %s680_s3 = inlined_call_operand.vmem [shape: f32[8,256], index: 3, kind: output, shape index: {}]  }
   0x1   :  { %s563_s14 = smov 0  }
   0x2 LB: > { %s22_s15 = sadd.s32 1, %s532_s13  ;;  %p477_p0 = scmp.ge.s32.totalorder %s536_s14, 1  ;;  %s536_s14 = sphi %s563_s14, %s13_s14   ;;  %s532_s13 = sphi %s561_s13, %s682_s13   ;;  %s528_s12 = sphi %s559_s12, %s681_s12  }
   0x3   : > { %p23_p1 = scmp.ge.s32.totalorder %s22_s15, 5  ;;  %p168_p2 = scmp.lt.s32.totalorder %s536_s14, 6 }
   0x5   : > { %s684_s15 = smov (%p23_p1, %s22_s15), 0  ;;  %p169_p3 = pnand %p477_p0, %p168_p2 }
   0x6   : > { %s478_s16 = sshll.u32 (!%p169_p3), %s528_s12, 1  ;;  %s480_s17 = sshll.u32 (!%p169_p3), %s528_s12, 5 }
   0x7   : > { %172 = sbr.rel (%p169_p3) target bundleno = 296 (0x128), region = 32  ;;  %p205_p4 = scmp.lt.s32.totalorder (!%p169_p3), %s478_s16, 9 }
   0x8   : > { %p213_p5 = scmp.lt.s32.totalorder (!%p169_p3), %s480_s17, 159  ;;  %p483_p6 = scmp.ne.s32.totalorder (!%p169_p3), %s528_s12, 0 }
   0xc   : > { %s686_s16 = smov (!%p205_p4, %s478_s16), 9  ;;  %s688_s17 = smov (!%p213_p5, %s480_s17), 159 }
   0xd   : > { %s479_s18 = sshll.u32 %s686_s16, 3  ;;  %s488_s22 = sshll.u32 %s688_s17, 4 }
   0xe   : > { %s584_s21 = scalar_lea.vmem %s677_s0, %s479_s18  ;;  %s589_s25 = scalar_lea.vmem %s678_s1, %s488_s22 }
   0xf   : > { %227 = sbr.rel (%p483_p6) target bundleno = 22 (0x16), region = 36 }
  0x14   : > { %v538_v0 = vmov 0.0  }
  0x15   : > { %228 = vst [vmem:[#allocation2] sm:$0xff] %v538_v0  ;;  %229 = vst [vmem:[#allocation2 + $0x8] sm:$0xff] %v538_v0 }
  0x16 PF: > { %v265_v1 = vld [vmem:[%s589_s25 + $0xf8] sm:$0xff]  ;;  %v264_v2 = vld [vmem:[%s589_s25 + $0xf0] sm:$0xff]  ;;  %v263_v3 = vld [vmem:[%s589_s25 + $0xe8] sm:$0xff]  ;;  %p484_p7 = scmp.ne.s32.totalorder %s528_s12, 4 }
  0x17   : > { %298 = vmatprep.subr.mxu0 %v265_v1  ;;  %v262_v4 = vld [vmem:[%s589_s25 + $0xe0] sm:$0xff]  ;;  %v261_v5 = vld [vmem:[%s589_s25 + $0xd8] sm:$0xff]  ;;  %v260_v6 = vld [vmem:[%s589_s25 + $0xd0] sm:$0xff] }
  0x18   : > { %299 = vmatpush1.msra.mxu0 %v264_v2  ;;  %v259_v7 = vld [vmem:[%s589_s25 + $0xc8] sm:$0xff]  ;;  %v258_v8 = vld [vmem:[%s589_s25 + $0xc0] sm:$0xff]  ;;  %v257_v9 = vld [vmem:[%s589_s25 + $0xb8] sm:$0xff] }
  0x19   : > { %300 = vmatprep.subr.mxu0 %v263_v3  ;;  %v256_v10 = vld [vmem:[%s589_s25 + $0xb0] sm:$0xff]  ;;  %v255_v11 = vld [vmem:[%s589_s25 + $0xa8] sm:$0xff]  ;;  %v254_v12 = vld [vmem:[%s589_s25 + $0xa0] sm:$0xff] }
  0x1a   : > { %301 = vmatpush1.msra.mxu0 %v262_v4  ;;  %v253_v13 = vld [vmem:[%s589_s25 + $0x98] sm:$0xff]  ;;  %v252_v14 = vld [vmem:[%s589_s25 + $0x90] sm:$0xff]  ;;  %v251_v15 = vld [vmem:[%s589_s25 + $0x88] sm:$0xff] }
  0x1b   : > { %302 = vmatprep.subr.mxu0 %v261_v5  ;;  %v250_v16 = vld [vmem:[%s589_s25 + $0x80] sm:$0xff]  ;;  %v249_v17 = vld [vmem:[%s589_s25 + $0x78] sm:$0xff]  ;;  %v248_v18 = vld [vmem:[%s589_s25 + $0x70] sm:$0xff] }
  0x1c   : > { %303 = vmatpush1.msra.mxu0 %v260_v6  ;;  %v247_v19 = vld [vmem:[%s589_s25 + $0x68] sm:$0xff]  ;;  %v246_v20 = vld [vmem:[%s589_s25 + $0x60] sm:$0xff]  ;;  %v245_v21 = vld [vmem:[%s589_s25 + $0x58] sm:$0xff] }
  0x1d   : > { %304 = vmatprep.subr.mxu0 %v259_v7  ;;  %v244_v22 = vld [vmem:[%s589_s25 + $0x50] sm:$0xff]  ;;  %v243_v23 = vld [vmem:[%s589_s25 + $0x48] sm:$0xff]  ;;  %v242_v24 = vld [vmem:[%s589_s25 + $0x40] sm:$0xff] }
  0x1e   : > { %305 = vmatpush1.msra.mxu0 %v258_v8  ;;  %v233_v25 = vld [vmem:[%s584_s21 + $0x8] sm:$0xff]  ;;  %v241_v26 = vld [vmem:[%s589_s25 + $0x38] sm:$0xff]  ;;  %v240_v27 = vld [vmem:[%s589_s25 + $0x30] sm:$0xff] }
  0x1f   : > { %306 = vmatprep.subr.mxu0 %v257_v9  ;;  %362 = vmatprep.mubr.f32.mxu0 %v233_v25  ;;  %v239_v28 = vld [vmem:[%s589_s25 + $0x28] sm:$0xff]  ;;  %v238_v29 = vld [vmem:[%s589_s25 + $0x20] sm:$0xff]  ;;  %v237_v30 = vld [vmem:[%s589_s25 + $0x18] sm:$0xff] }
  0x20   : > { %307 = vmatpush1.msra.mxu0 %v256_v10  ;;  %v236_v31 = vld [vmem:[%s589_s25 + $0x10] sm:$0xff]  ;;  %v235_v32 = vld [vmem:[%s589_s25 + $0x8] sm:$0xff]  ;;  %v234_v33 = vld [vmem:[%s589_s25] sm:$0xff] }
  0x21   : > { %308 = vmatprep.subr.mxu0 %v255_v11  ;;  %v297_v34 = vld [vmem:[%s589_s25 + $0x1f8] sm:$0xff]  ;;  %v296_v35 = vld [vmem:[%s589_s25 + $0x1f0] sm:$0xff]  ;;  %v295_v36 = vld [vmem:[%s589_s25 + $0x1e8] sm:$0xff] }
  0x22   : > { %309 = vmatpush1.msra.mxu0 %v254_v12  ;;  %v294_v37 = vld [vmem:[%s589_s25 + $0x1e0] sm:$0xff]  ;;  %v293_v38 = vld [vmem:[%s589_s25 + $0x1d8] sm:$0xff]  ;;  %v292_v39 = vld [vmem:[%s589_s25 + $0x1d0] sm:$0xff] }
  0x23   : > { %310 = vmatprep.subr.mxu0 %v253_v13  ;;  %v291_v40 = vld [vmem:[%s589_s25 + $0x1c8] sm:$0xff]  ;;  %v290_v41 = vld [vmem:[%s589_s25 + $0x1c0] sm:$0xff]  ;;  %v289_v42 = vld [vmem:[%s589_s25 + $0x1b8] sm:$0xff] }
  0x24   : > { %311 = vmatpush1.msra.mxu0 %v252_v14  ;;  %v288_v43 = vld [vmem:[%s589_s25 + $0x1b0] sm:$0xff]  ;;  %v287_v44 = vld [vmem:[%s589_s25 + $0x1a8] sm:$0xff]  ;;  %v286_v45 = vld [vmem:[%s589_s25 + $0x1a0] sm:$0xff] }
  0x25   : > { %312 = vmatprep.subr.mxu0 %v251_v15  ;;  %v285_v46 = vld [vmem:[%s589_s25 + $0x198] sm:$0xff]  ;;  %v284_v47 = vld [vmem:[%s589_s25 + $0x190] sm:$0xff]  ;;  %v283_v48 = vld [vmem:[%s589_s25 + $0x188] sm:$0xff] }
  0x26   : > { %313 = vmatpush1.msra.mxu0 %v250_v16  ;;  %v282_v49 = vld [vmem:[%s589_s25 + $0x180] sm:$0xff]  ;;  %v281_v50 = vld [vmem:[%s589_s25 + $0x178] sm:$0xff]  ;;  %v280_v51 = vld [vmem:[%s589_s25 + $0x170] sm:$0xff] }
  0x27   : > { %314 = vmatprep.subr.mxu0 %v249_v17  ;;  %v279_v52 = vld [vmem:[%s589_s25 + $0x168] sm:$0xff]  ;;  %v278_v53 = vld [vmem:[%s589_s25 + $0x160] sm:$0xff]  ;;  %v277_v54 = vld [vmem:[%s589_s25 + $0x158] sm:$0xff] }
  0x28   : > { %315 = vmatpush1.msra.mxu0 %v248_v18  ;;  %v276_v55 = vld [vmem:[%s589_s25 + $0x150] sm:$0xff]  ;;  %v275_v56 = vld [vmem:[%s589_s25 + $0x148] sm:$0xff]  ;;  %v274_v57 = vld [vmem:[%s589_s25 + $0x140] sm:$0xff] }
  0x29   : > { %316 = vmatprep.subr.mxu0 %v247_v19  ;;  %v273_v58 = vld [vmem:[%s589_s25 + $0x138] sm:$0xff]  ;;  %v272_v59 = vld [vmem:[%s589_s25 + $0x130] sm:$0xff]  ;;  %v271_v60 = vld [vmem:[%s589_s25 + $0x128] sm:$0xff] }
  0x2a   : > { %317 = vmatpush1.msra.mxu0 %v246_v20  ;;  %v270_v61 = vld [vmem:[%s589_s25 + $0x120] sm:$0xff]  ;;  %v269_v62 = vld [vmem:[%s589_s25 + $0x118] sm:$0xff]  ;;  %v268_v63 = vld [vmem:[%s589_s25 + $0x110] sm:$0xff] }
  0x2b   : > { %318 = vmatprep.subr.mxu0 %v245_v21  ;;  %v267_v0 = vld [vmem:[%s589_s25 + $0x108] sm:$0xff]  ;;  %v266_v1 = vld [vmem:[%s589_s25 + $0x100] sm:$0xff] }
  0x2c   : > { %319 = vmatpush1.msra.mxu0 %v244_v22  ;;  %v232_v2 = vld [vmem:[%s584_s21] sm:$0xff]  ;;  %v231_v5 = vld [vmem:[#allocation2 + $0x8] sm:$0xff] }
  0x2d   : > { %320 = vmatprep.subr.mxu0 %v243_v23  ;;  %v230_v3 = vld [vmem:[#allocation2] sm:$0xff] }
  0x2e   : > { %321 = vmatpush1.msra.mxu0 %v242_v24 }
  0x2f   : > { %322 = vmatprep.subr.mxu0 %v241_v26 }
  0x30   : > { %323 = vmatpush1.msra.mxu0 %v240_v27 }
  0x31   : > { %324 = vmatprep.subr.mxu0 %v239_v28 }
  0x32   : > { %325 = vmatpush1.msra.mxu0 %v238_v29 }
  0x33   : > { %326 = vmatprep.subr.mxu0 %v237_v30 }
  0x34   : > { %327 = vmatpush1.msra.mxu0 %v236_v31 }
  0x35   : > { %328 = vmatprep.subr.mxu0 %v235_v32 }
  0x36   : > { %329 = vmatpush1.msra.mxu0 %v234_v33 }
  0x37   : > { %330 = vmatprep.subr.mxu0 %v297_v34 }
  0x38   : > { %331 = vmatpush2.msra.mxu0 %v296_v35 }
  0x39   : > { %332 = vmatprep.subr.mxu0 %v295_v36 }
  0x3a   : > { %333 = vmatpush2.msra.mxu0 %v294_v37 }
  0x3b   : > { %334 = vmatprep.subr.mxu0 %v293_v38 }
  0x3c   : > { %335 = vmatpush2.msra.mxu0 %v292_v39 }
  0x3d   : > { %336 = vmatprep.subr.mxu0 %v291_v40 }
  0x3e   : > { %337 = vmatpush2.msra.mxu0 %v290_v41 }
  0x3f   : > { %338 = vmatprep.subr.mxu0 %v289_v42 }
  0x40   : > { %339 = vmatpush2.msra.mxu0 %v288_v43 }
  0x41   : > { %340 = vmatprep.subr.mxu0 %v287_v44 }
  0x42   : > { %341 = vmatpush2.msra.mxu0 %v286_v45 }
  0x43   : > { %342 = vmatprep.subr.mxu0 %v285_v46 }
  0x44   : > { %343 = vmatpush2.msra.mxu0 %v284_v47 }
  0x45   : > { %344 = vmatprep.subr.mxu0 %v283_v48 }
  0x46   : > { %345 = vmatpush2.msra.mxu0 %v282_v49 }
  0x47   : > { %346 = vmatprep.subr.mxu0 %v281_v50 }
  0x48   : > { %347 = vmatpush2.msra.mxu0 %v280_v51 }
  0x49   : > { %348 = vmatprep.subr.mxu0 %v279_v52 }
  0x4a   : > { %349 = vmatpush2.msra.mxu0 %v278_v53 }
  0x4b   : > { %350 = vmatprep.subr.mxu0 %v277_v54 }
  0x4c   : > { %351 = vmatpush2.msra.mxu0 %v276_v55 }
  0x4d   : > { %352 = vmatprep.subr.mxu0 %v275_v56 }
  0x4e   : > { %353 = vmatpush2.msra.mxu0 %v274_v57 }
  0x4f   : > { %354 = vmatprep.subr.mxu0 %v273_v58 }
  0x50   : > { %355 = vmatpush2.msra.mxu0 %v272_v59 }
  0x51   : > { %356 = vmatprep.subr.mxu0 %v271_v60 }
  0x52   : > { %357 = vmatpush2.msra.mxu0 %v270_v61 }
  0x53   : > { %358 = vmatprep.subr.mxu0 %v269_v62 }
  0x54   : > { %359 = vmatpush2.msra.mxu0 %v268_v63 }
  0x55   : > { %360 = vmatprep.subr.mxu0 %v267_v0 }
  0x56   : > { %361 = vmatpush2.msra.mxu0 %v266_v1 }
  0x57   : > { %363 = vmatmul.mubr.f32.vlgmr.msra.gmra.mxu0 %v232_v2 }
 0x117   : > { %v364_v4 = vpop.f32.mrf.mxu0 }
 0x118   : > { %v369_v6 = vadd.f32 %v364_v4, %v230_v3  ;;  %376 = sbr.rel (%p484_p7) target bundleno = 296 (0x128), region = 40 }
 0x119   : > { %v366_v7 = vpop.f32.mrf.mxu0 }
 0x11a   : > { %371 = vst [vmem:[#allocation2] sm:$0xff] %v369_v6  ;;  %v370_v8 = vadd.f32 %v366_v7, %v231_v5 }
 0x11c   : > { %372 = vst [vmem:[#allocation2 + $0x8] sm:$0xff] %v370_v8 }
 0x11d   : > { %v381_v9 = vlaneseq  ;;  %v379_v11 = vld [vmem:[%s679_s2] sm:$0x3] }
 0x11f   : > { %v382_v10 = vshrl.u32 %v381_v9, 7 }
 0x121   : > { %v383_v12 = vsub.s32 0, %v382_v10  ;;  %v387_v13 = vsub.s32 1, %v382_v10  ;;  %v377_v14 = vld [vmem:[#allocation2] sm:$0xff] }
 0x123   : > { %v378_v15 = vld [vmem:[#allocation2 + $0x8] sm:$0xff]  ;;  %v384_v16 = vrot.slane %v379_v11, %v383_v12  ;;  %v388_v17 = vrot.slane %v379_v11, %v387_v13 }
 0x125   : > { %v391_v18 = vadd.f32 %v384_v16, %v377_v14  ;;  %v392_v19 = vadd.f32 %v388_v17, %v378_v15 }
 0x127   : > { %393 = vst [vmem:[%s680_s3] sm:$0xff] %v391_v18  ;;  %394 = vst [vmem:[%s680_s3 + $0x8] sm:$0xff] %v392_v19 }
 0x128 PF: > { %s13_s14 = sadd.s32 1, %s536_s14   ;;  %s681_s12 = smov %s532_s13 }
 0x129   : > { %p10_p8 = scmp.ge.s32.totalorder %s13_s14, 7   ;;  %s682_s13 = smov %s684_s15 }
 0x12b   :  { %12 = sbr.rel (!%p10_p8) target bundleno = 2 (0x2), region = 73 }

</bundles_post_ra>
